<compile_context>
chip_gen: v5e
topology: v5e:2x2
jax: 0.10.0
libtpu: 0.0.40
codegen_flags: <defaults>
</compile_context>

<pallas_src>
import functools

import jax
import jax.numpy as jnp
from jax.experimental import pallas as pl
from jax.experimental.pallas import tpu as pltpu

# ---------------- configuration (small synthetic shapes) ----------------
N = 2            # batch
C_IN = 3         # RGB input channels
H = W = 32       # input spatial
KSIZE = 3        # stem conv kernel
STRIDE = 2
PAD = 1
C_FEAT = 128     # stands in for backbone_output (=1792 for efficientnet-b4); lane-dense
BN_EPS = 1e-5

LANE = 128


def _round_up(x, m):
    return (x + m - 1) // m * m


# ---------------- fused Pallas kernel: stem matmul + swish + streaming BN / pool stats ------
def _stem_stats_kernel(p_ref, w_ref, b_ref, pool_ref, sq_ref, *,
                       n_samples, hw, tm, rows_per_split, n_rows_real, need_row_mask):
    # p_ref   : (tm, K)            bf16 im2col patch tile (true K, no lane padding in HBM)
    # w_ref   : (K, C_pad)         bf16 stem weights, fully resident (single channel tile)
    # b_ref   : (1, C_pad)         f32  stem bias
    # pool_ref: (1, n_samples, C_pad) f32 per-split per-sample pooled sums   (accumulator)
    # sq_ref  : (1, 1, C_pad)         f32 per-split per-channel sum of squares (accumulator)
    s = pl.program_id(0)   # "parallel" split axis (v7x core split; no-op on v5e/v6e)
    i = pl.program_id(1)   # "arbitrary" row-tile reduction axis (last)

    @pl.when(i == 0)
    def _init():
        pool_ref[...] = jnp.zeros_like(pool_ref)
        sq_ref[...] = jnp.zeros_like(sq_ref)

    # stem conv as MXU matmul (bf16 operands, f32 accumulation) + bias + swish
    acc = jnp.dot(p_ref[...], w_ref[...], preferred_element_type=jnp.float32)
    acc = acc + b_ref[...]
    feat = acc * jax.nn.sigmoid(acc)                        # (tm, C_pad) f32

    row0 = s * rows_per_split + i * tm                      # global row offset of this tile

    if need_row_mask:
        # zero out padded rows (conv of zero patches + bias would otherwise pollute sumsq)
        rvec = row0 + jax.lax.broadcasted_iota(jnp.int32, (tm, 1), 0)
        feat = feat * (rvec < n_rows_real).astype(jnp.float32)

    # per-sample pooled sums via a tiny one-hot MXU matmul (no tm | hw requirement):
    # onehot[n, r] = 1 iff global row (row0 + r) belongs to sample n
    rows_b = row0 + jax.lax.broadcasted_iota(jnp.int32, (n_samples, tm), 1)
    samp_lo = hw * jax.lax.broadcasted_iota(jnp.int32, (n_samples, tm), 0)
    onehot = jnp.logical_and(rows_b >= samp_lo, rows_b < samp_lo + hw).astype(jnp.float32)

    pooled_tile = jnp.dot(onehot, feat, preferred_element_type=jnp.float32)  # (n_samples, C_pad)
    pool_ref[...] += pooled_tile[None]
    sq_ref[...] += jnp.sum(feat * feat, axis=0, keepdims=True)[None]


def fused_stem_bn_stats(patches_bf16, w_pad_bf16, bias_pad_f32, *, n_samples, hw,
                        tm=256, n_splits=2):
    """Runs the fused kernel; returns (pooled_sums (N, C_pad), sum_sq (C_pad,)) in f32."""
    R, K = patches_bf16.shape
    Kw, C_pad = w_pad_bf16.shape
    assert Kw == K
    n_rows_real = n_samples * hw
    assert R == n_rows_real

    # pad rows to a multiple of n_splits * tm (no-op for the demo shapes)
    R_pad = _round_up(R, n_splits * tm)
    if R_pad != R:
        patches_bf16 = jnp.pad(patches_bf16, ((0, R_pad - R), (0, 0)))
    rows_per_split = R_pad // n_splits
    steps = rows_per_split // tm

    kernel = functools.partial(
        _stem_stats_kernel,
        n_samples=n_samples, hw=hw, tm=tm,
        rows_per_split=rows_per_split, n_rows_real=n_rows_real,
        need_row_mask=(R_pad != n_rows_real),
    )

    cost = pl.CostEstimate(
        flops=2 * R_pad * K * C_pad + 2 * R_pad * n_samples * C_pad,
        transcendentals=R_pad * C_pad,
        bytes_accessed=(R_pad * K * 2 + K * C_pad * 2 + C_pad * 4
                        + n_splits * (n_samples + 1) * C_pad * 4),
    )

    # VMEM budget (per step): patches tile tm*K*2B (double buffered) + resident weights
    # K*C_pad*2B + f32 accumulators -> well under 1 MiB here; even b4-scale (K=27*C_in,
    # C_pad=1792, tm=512) stays ~5 MiB, safely inside v7x's 64 MiB.
    # NOTE: for v5e, consider pipeline_mode=pl.Buffered(3) on the patches BlockSpec once
    # grids get long enough for DMA exposure to matter.
    pooled_p, sq_p = pl.pallas_call(
        kernel,
        out_shape=(
            jax.ShapeDtypeStruct((n_splits, n_samples, C_pad), jnp.float32),
            jax.ShapeDtypeStruct((n_splits, 1, C_pad), jnp.float32),
        ),
        grid_spec=pltpu.PrefetchScalarGridSpec(
            num_scalar_prefetch=0,
            grid=(n_splits, steps),                       # (core split, row-tile reduction)
            in_specs=[
                pl.BlockSpec((tm, K), lambda s, i: (s * steps + i, 0)),   # patches (streamed)
                pl.BlockSpec((K, C_pad), lambda s, i: (0, 0)),            # weights (resident)
                pl.BlockSpec((1, C_pad), lambda s, i: (0, 0)),            # bias
            ],
            out_specs=[
                pl.BlockSpec((1, n_samples, C_pad), lambda s, i: (s, 0, 0)),
                pl.BlockSpec((1, 1, C_pad), lambda s, i: (s, 0, 0)),
            ],
        ),
        compiler_params=pltpu.CompilerParams(
            dimension_semantics=("parallel", "arbitrary"),
            vmem_limit_bytes=32 * 1024 * 1024,
        ),
        cost_estimate=cost,
    )(patches_bf16, w_pad_bf16, bias_pad_f32)

    pooled = jnp.sum(pooled_p, axis=0)    # (n_samples, C_pad)
    sumsq = jnp.sum(sq_p, axis=0)[0]      # (C_pad,)
    return pooled, sumsq


# ---------------- glue: im2col (plain JAX, bf16 in -> bf16 patches, single materialization) -
def im2col(x_nhwc, k=KSIZE, stride=STRIDE, pad=PAD):
    n, h, w, c = x_nhwc.shape
    xp = jnp.pad(x_nhwc, ((0, 0), (pad, pad), (pad, pad), (0, 0)))
    ho = (h + 2 * pad - k) // stride + 1
    wo = (w + 2 * pad - k) // stride + 1
    patches = []
    for i in range(k):
        for j in range(k):
            patches.append(xp[:, i:i + stride * ho:stride, j:j + stride * wo:stride, :])
    p = jnp.concatenate(patches, axis=-1)              # (N, Ho, Wo, k*k*C)
    return p.reshape(n * ho * wo, k * k * c), (n, ho, wo)


# ---------------- one-time parameter preparation (hoisted out of the forward path) ----------
def prepare_params(params):
    K, C = params["w_stem"].shape
    C_pad = _round_up(C, LANE)
    return {
        "w": jnp.pad(params["w_stem"], ((0, 0), (0, C_pad - C))).astype(jnp.bfloat16),
        "b": jnp.pad(params["b_stem"].astype(jnp.float32), ((0, 0), (0, C_pad - C))),
        "gamma": params["gamma"][0].astype(jnp.float32),   # (C,)
        "beta": params["beta"][0].astype(jnp.float32),     # (C,)
    }


# ---------------- full forward ----------------
def efficient_backbone_forward(x_nchw, prepared):
    # NCHW (PyTorch) -> NHWC internal layout (channels on the 128-lane axis), bf16 once
    x_nhwc = jnp.transpose(x_nchw, (0, 2, 3, 1)).astype(jnp.bfloat16)
    patches, (n, ho, wo) = im2col(x_nhwc)                  # bf16 (R, K)
    hw = ho * wo

    pooled, sumsq = fused_stem_bn_stats(patches, prepared["w"], prepared["b"],
                                        n_samples=n, hw=hw)

    # tiny epilogue on (N, C): BatchNorm2d (training-mode batch stats) applied to the pooled
    # mean (equivalent by linearity) + AdaptiveAvgPool2d(1) normalization + flatten.
    C = prepared["gamma"].shape[0]
    pooled = pooled[:, :C]
    sumsq = sumsq[:C]
    total = float(n * hw)
    mu = jnp.sum(pooled, axis=0) / total                         # (C,)
    var = jnp.maximum(sumsq / total - mu * mu, 0.0)              # clamp: avoid f32 negative var
    inv = jax.lax.rsqrt(var + BN_EPS)
    pooled_mean = pooled / float(hw)                             # AdaptiveAvgPool2d(1)
    out = prepared["gamma"] * (pooled_mean - mu) * inv + prepared["beta"]
    return out                                                   # (N, C) == output.view(B, -1)


# ---------------- pure-JAX reference ----------------
def reference_forward(x_nchw, params):
    x_nhwc = jnp.transpose(x_nchw, (0, 2, 3, 1)).astype(jnp.bfloat16)
    patches, (n, ho, wo) = im2col(x_nhwc)
    p = patches.astype(jnp.float32)
    w = params["w_stem"].astype(jnp.bfloat16).astype(jnp.float32)
    acc = jnp.dot(p, w, precision=jax.lax.Precision.HIGHEST) + params["b_stem"]
    feat = acc * jax.nn.sigmoid(acc)
    feat = feat.reshape(n, ho * wo, C_FEAT)
    mu = feat.mean(axis=(0, 1), keepdims=True)
    var = ((feat - mu) ** 2).mean(axis=(0, 1), keepdims=True)
    norm = (feat - mu) / jnp.sqrt(var + BN_EPS) * params["gamma"][None] + params["beta"][None]
    return norm.mean(axis=1)


if __name__ == "__main__":
    key = jax.random.PRNGKey(0)
    k_x, k_w, k_b, k_g, k_be = jax.random.split(key, 5)

    x = jax.random.normal(k_x, (N, C_IN, H, W), dtype=jnp.float32)

    params = {
        "w_stem": 0.1 * jax.random.normal(k_w, (KSIZE * KSIZE * C_IN, C_FEAT), dtype=jnp.float32),
        "b_stem": 0.05 * jax.random.normal(k_b, (1, C_FEAT), dtype=jnp.float32),
        "gamma": 1.0 + 0.1 * jax.random.normal(k_g, (1, C_FEAT), dtype=jnp.float32),
        "beta": 0.1 * jax.random.normal(k_be, (1, C_FEAT), dtype=jnp.float32),
    }

    prepared = prepare_params(params)   # pad/cast once, outside the forward path

    fwd = jax.jit(efficient_backbone_forward)
    out = fwd(x, prepared)
    out = jax.block_until_ready(out)

    ref = reference_forward(x, params)
    assert out.shape == (N, C_FEAT), out.shape
    max_err = float(jnp.max(jnp.abs(out - ref)))
    assert jnp.allclose(out, ref, atol=2e-3, rtol=2e-3), max_err

    print("KERNEL_OK")
</pallas_src>

<mosaic_0001>
module attributes {stable_mosaic.version = 11 : i64} {
  func.func @_stem_stats_kernel(%arg0: i32, %arg1: i32, %arg2: memref<256x27xbf16, #tpu.memory_space<vmem>>, %arg3: memref<27x128xbf16, #tpu.memory_space<vmem>>, %arg4: memref<1x128xf32, #tpu.memory_space<vmem>>, %arg5: memref<1x2x128xf32, #tpu.memory_space<vmem>>, %arg6: memref<1x1x128xf32, #tpu.memory_space<vmem>>) attributes {dimension_semantics = [#tpu.dimension_semantics<parallel>, #tpu.dimension_semantics<arbitrary>], iteration_bounds = array<i64: 2, 1>, scalar_prefetch = 0 : i64, scratch_operands = 0 : i64, tpu.core_type = #tpu.core_type<tc>, window_params = [{transform_indices = @transform_0, window_bounds = array<i64: 256, 27>}, {pipeline_mode = #tpu.pipeline_mode<synchronous>, transform_indices = @transform_1, window_bounds = array<i64: 27, 128>}, {pipeline_mode = #tpu.pipeline_mode<synchronous>, transform_indices = @transform_2, window_bounds = array<i64: 1, 128>}, {transform_indices = @transform_3, window_bounds = array<i64: 1, 2, 128>}, {transform_indices = @transform_4, window_bounds = array<i64: 1, 1, 128>}]} {
    %c0_i32 = arith.constant 0 : i32
    %0 = arith.cmpi eq, %arg1, %c0_i32 : i32
    %1 = arith.extui %0 : i1 to i32
    %c0_i32_0 = arith.constant 0 : i32
    %2 = arith.cmpi ne, %1, %c0_i32_0 : i32
    scf.if %2 {
      %cst_24 = arith.constant 0.000000e+00 : f32
      %43 = vector.broadcast %cst_24 : f32 to vector<1x2x128xf32>
      %c0_25 = arith.constant 0 : index
      %c0_26 = arith.constant 0 : index
      %c0_27 = arith.constant 0 : index
      %44 = vector.load %arg5[%c0_25, %c0_26, %c0_27] : memref<1x2x128xf32, #tpu.memory_space<vmem>>, vector<1x2x128xf32>
      tpu.vector_store %arg5[%c0_25, %c0_26, %c0_27], %43 {strides = array<i32>} : memref<1x2x128xf32, #tpu.memory_space<vmem>>, vector<1x2x128xf32>,
      %cst_28 = arith.constant 0.000000e+00 : f32
      %45 = vector.broadcast %cst_28 : f32 to vector<1x1x128xf32>
      %c0_29 = arith.constant 0 : index
      %c0_30 = arith.constant 0 : index
      %c0_31 = arith.constant 0 : index
      %46 = vector.load %arg6[%c0_29, %c0_30, %c0_31] : memref<1x1x128xf32, #tpu.memory_space<vmem>>, vector<1x1x128xf32>
      tpu.vector_store %arg6[%c0_29, %c0_30, %c0_31], %45 {strides = array<i32>} : memref<1x1x128xf32, #tpu.memory_space<vmem>>, vector<1x1x128xf32>,
    } else {
    }
    %c0 = arith.constant 0 : index
    %c0_1 = arith.constant 0 : index
    %3 = vector.load %arg2[%c0, %c0_1] : memref<256x27xbf16, #tpu.memory_space<vmem>>, vector<256x27xbf16>
    %c0_2 = arith.constant 0 : index
    %c0_3 = arith.constant 0 : index
    %4 = vector.load %arg3[%c0_2, %c0_3] : memref<27x128xbf16, #tpu.memory_space<vmem>>, vector<27x128xbf16>
    %cst = arith.constant dense<0.000000e+00> : vector<256x128xf32>
    %5 = tpu.matmul %3, %4, %cst {dimension_numbers = #tpu.dot_dimension_numbers<[1], [0], [0], [1], [0, 0, 1, 1], [], []>} : vector<256x27xbf16>, vector<27x128xbf16>, vector<256x128xf32> -> vector<256x128xf32>
    %c0_4 = arith.constant 0 : index
    %c0_5 = arith.constant 0 : index
    %6 = vector.load %arg4[%c0_4, %c0_5] : memref<1x128xf32, #tpu.memory_space<vmem>>, vector<1x128xf32>
    %7 = vector.broadcast %6 : vector<1x128xf32> to vector<256x128xf32>
    %8 = arith.addf %5, %7 : vector<256x128xf32>
    %9 = arith.negf %8 : vector<256x128xf32>
    %10 = math.exp %9 : vector<256x128xf32>
    %cst_6 = arith.constant 1.000000e+00 : f32
    %11 = vector.broadcast %cst_6 : f32 to vector<256x128xf32>
    %12 = arith.addf %11, %10 : vector<256x128xf32>
    %13 = arith.divf %11, %12 : vector<256x128xf32>
    %14 = arith.mulf %8, %13 : vector<256x128xf32>
    %c256_i32 = arith.constant 256 : i32
    %15 = arith.muli %arg0, %c256_i32 : i32
    %c256_i32_7 = arith.constant 256 : i32
    %16 = arith.muli %arg1, %c256_i32_7 : i32
    %17 = arith.addi %15, %16 : i32
    %18 = tpu.iota {dimensions = array<i32: 1>} : vector<2x256xi32>
    %19 = vector.broadcast %17 : i32 to vector<2x256xi32>
    %20 = arith.addi %19, %18 : vector<2x256xi32>
    %21 = tpu.iota {dimensions = array<i32: 0>} : vector<2x256xi32>
    %c256_i32_8 = arith.constant 256 : i32
    %22 = vector.broadcast %c256_i32_8 : i32 to vector<2x256xi32>
    %23 = arith.muli %22, %21 : vector<2x256xi32>
    %24 = arith.cmpi sge, %20, %23 : vector<2x256xi32>
    %c256_i32_9 = arith.constant 256 : i32
    %25 = vector.broadcast %c256_i32_9 : i32 to vector<2x256xi32>
    %26 = arith.addi %23, %25 : vector<2x256xi32>
    %27 = arith.cmpi slt, %20, %26 : vector<2x256xi32>
    %28 = arith.andi %24, %27 : vector<2x256xi1>
    %29 = arith.extui %28 : vector<2x256xi1> to vector<2x256xi32>
    %30 = arith.sitofp %29 : vector<2x256xi32> to vector<2x256xf32>
    %cst_10 = arith.constant dense<0.000000e+00> : vector<2x128xf32>
    %31 = tpu.matmul %30, %14, %cst_10 {dimension_numbers = #tpu.dot_dimension_numbers<[1], [0], [0], [1], [0, 0, 1, 1], [], []>} : vector<2x256xf32>, vector<256x128xf32>, vector<2x128xf32> -> vector<2x128xf32>
    %c0_11 = arith.constant 0 : index
    %c0_12 = arith.constant 0 : index
    %c0_13 = arith.constant 0 : index
    %32 = vector.load %arg5[%c0_11, %c0_12, %c0_13] : memref<1x2x128xf32, #tpu.memory_space<vmem>>, vector<1x2x128xf32>
    %33 = vector.shape_cast %31 : vector<2x128xf32> to vector<1x2x128xf32>
    %34 = arith.addf %32, %33 : vector<1x2x128xf32>
    %c0_14 = arith.constant 0 : index
    %c0_15 = arith.constant 0 : index
    %c0_16 = arith.constant 0 : index
    %35 = vector.load %arg5[%c0_14, %c0_15, %c0_16] : memref<1x2x128xf32, #tpu.memory_space<vmem>>, vector<1x2x128xf32>
    tpu.vector_store %arg5[%c0_14, %c0_15, %c0_16], %34 {strides = array<i32>} : memref<1x2x128xf32, #tpu.memory_space<vmem>>, vector<1x2x128xf32>,
    %c0_17 = arith.constant 0 : index
    %c0_18 = arith.constant 0 : index
    %c0_19 = arith.constant 0 : index
    %36 = vector.load %arg6[%c0_17, %c0_18, %c0_19] : memref<1x1x128xf32, #tpu.memory_space<vmem>>, vector<1x1x128xf32>
    %37 = arith.mulf %14, %14 : vector<256x128xf32>
    %cst_20 = arith.constant dense<0.000000e+00> : vector<128xf32>
    %38 = vector.multi_reduction <add>, %37, %cst_20 [0] : vector<256x128xf32> to vector<128xf32>
    %39 = vector.shape_cast %38 : vector<128xf32> to vector<1x128xf32>
    %40 = vector.shape_cast %39 : vector<1x128xf32> to vector<1x1x128xf32>
    %41 = arith.addf %36, %40 : vector<1x1x128xf32>
    %c0_21 = arith.constant 0 : index
    %c0_22 = arith.constant 0 : index
    %c0_23 = arith.constant 0 : index
    %42 = vector.load %arg6[%c0_21, %c0_22, %c0_23] : memref<1x1x128xf32, #tpu.memory_space<vmem>>, vector<1x1x128xf32>
    tpu.vector_store %arg6[%c0_21, %c0_22, %c0_23], %41 {strides = array<i32>} : memref<1x1x128xf32, #tpu.memory_space<vmem>>, vector<1x1x128xf32>,
    return
  }
  func.func @transform_0(%arg0: i32, %arg1: i32) -> (i32, i32) {
    %c1_i32 = arith.constant 1 : i32
    %0 = arith.muli %arg0, %c1_i32 : i32
    %1 = arith.addi %0, %arg1 : i32
    %c0_i32 = arith.constant 0 : i32
    %c0_i32_0 = arith.constant 0 : i32
    return %1, %c0_i32 : i32, i32
  }
  func.func @transform_1(%arg0: i32, %arg1: i32) -> (i32, i32) {
    %c0_i32 = arith.constant 0 : i32
    %c0_i32_0 = arith.constant 0 : i32
    %c0_i32_1 = arith.constant 0 : i32
    return %c0_i32, %c0_i32_0 : i32, i32
  }
  func.func @transform_2(%arg0: i32, %arg1: i32) -> (i32, i32) {
    %c0_i32 = arith.constant 0 : i32
    %c0_i32_0 = arith.constant 0 : i32
    %c0_i32_1 = arith.constant 0 : i32
    return %c0_i32, %c0_i32_0 : i32, i32
  }
  func.func @transform_3(%arg0: i32, %arg1: i32) -> (i32, i32, i32) {
    %c0_i32 = arith.constant 0 : i32
    %c0_i32_0 = arith.constant 0 : i32
    %c0_i32_1 = arith.constant 0 : i32
    return %arg0, %c0_i32, %c0_i32_0 : i32, i32, i32
  }
  func.func @transform_4(%arg0: i32, %arg1: i32) -> (i32, i32, i32) {
    %c0_i32 = arith.constant 0 : i32
    %c0_i32_0 = arith.constant 0 : i32
    %c0_i32_1 = arith.constant 0 : i32
    return %arg0, %c0_i32, %c0_i32_0 : i32, i32, i32
  }
}

</mosaic_0001>

<bundles_post_ra>
// kernel: efficient_backbone_forward.1
= control target key start
LH: loop header
LB: loop body
LE: loop exit
PB: predicated region body
PF: predicated region fallthrough
CT: control target
= control target key end

     0   :  { %s1740_s15 = smov 0   ;;  %s1742_s16 = smov 0   ;;  %s2868_s0 = inlined_call_operand.vmem [shape: bf16[512,27], index: 0, kind: input, shape index: {}]   ;;  %s2869_s1 = inlined_call_operand.vmem [shape: bf16[27,128], index: 1, kind: input, shape index: {}]   ;;  %s2870_s2 = inlined_call_operand.vmem [shape: f32[1,128], index: 2, kind: input, shape index: {}]   ;;  %s2871_s3 = inlined_call_operand.vmem [shape: f32[2,2,128], index: 3, kind: output, shape index: {0}]   ;;  %s2872_s4 = inlined_call_operand.vmem [shape: f32[2,1,128], index: 4, kind: output, shape index: {1}]  }
   0x1   :  { %s1744_s17 = smov 0  }
   0x2 LB: > { %s27_s18 = sadd.s32 1, %s1706_s16  ;;  %p1377_p0 = scmp.ge.s32.totalorder %s1710_s17, 1  ;;  %s1710_s17 = sphi %s1744_s17, %s15_s17   ;;  %s1706_s16 = sphi %s1742_s16, %s3069_s16   ;;  %s1702_s15 = sphi %s1740_s15, %s3068_s15  }
   0x3   : > { %p29_p1 = scmp.ge.s32.totalorder %s27_s18, 2  ;;  %p182_p2 = scmp.lt.s32.totalorder %s1710_s17, 3 }
   0x5   : > { %s3071_s18 = smov (%p29_p1, %s27_s18), 0  ;;  %p183_p3 = pnand %p1377_p0, %p182_p2 }
   0x7   : > { %186 = sbr.rel (%p183_p3) target bundleno = 466 (0x1d2), region = 32 }
   0xc   : > { %v1451_v0 = vld [vmem:[%s2869_s1 + $0x8] sm:$0xf]  ;;  %v1525_v1 = vld [vmem:[%s2869_s1 + $0x8] sm:$0x30]  ;;  %vm413_vm0 = vcmask 1044480   ;;  %vm414_vm1 = vcmask 1045504  }
   0xd   : > { %v1452_v2 = vor.u32 %v1525_v1, %v1451_v0  ;;  %s1378_s23 = sshll.u32 %s1702_s15, 5  ;;  %v1712_v3 = vmov 65535   ;;  %v1524_v7 = vld [vmem:[%s2869_s1] sm:$0xff]  ;;  %vm364_vm2 = vcmask 220160   ;;  %s1501_s6 = sshll.u32 %s1702_s15, 8 }
   0xe   : > { %v415_v4 = vsel %vm413_vm0, 4294967295, %v1712_v3  ;;  %p213_p4 = scmp.lt.s32.totalorder %s1378_s23, 63  ;;  %v1810_v24 = vld [vmem:[%s2870_s2] ss:$0 sm:$0xff]  ;;  %p219_p5 = scmp.lt.s32.totalorder %s1702_s15, 1 }
   0xf   : > { %v416_v5 = vsel %vm414_vm1, %v415_v4, 0 }
  0x10   : > { %v418_v6 = vand.u32 %v1452_v2, %v416_v5  ;;  %s3073_s23 = smov (!%p213_p4, %s1378_s23), 63  ;;  %s3075_s15 = smov (!%p219_p5, %s1702_s15), 1 }
  0x11   : > { %s1379_s26 = sshll.u32 %s3073_s23, 2  ;;  %s1380_s7 = sshll.u32 %s3075_s15, 1 }
  0x12   : > { %426 = vmatpush.bf16.msra.mxu0 %v418_v6  ;;  %1528 = vmatpush.bf16.msra.mxu3 %v418_v6  ;;  %s1773_s29 = scalar_lea.vmem %s2868_s0, %s1379_s26  ;;  %s222_s10 = scalar_lea.vmem %s2871_s3, %s1380_s7 }
  0x13   : > { %1527 = vmatpush.bf16.msra.mxu2 %v418_v6  ;;  %1526 = vmatpush.bf16.msra.mxu1 %v418_v6  ;;  %v1508_v8 = vld [vmem:[%s1773_s29] sm:$0xff]  ;;  %v1519_v9 = vld [vmem:[%s1773_s29 + $0x58] sm:$0xff]  ;;  %v1513_v11 = vld [vmem:[%s1773_s29 + $0x28] sm:$0xff]  ;;  %s225_s13 = scalar_lea.vmem %s2872_s4, %s3075_s15 }
  0x14   : > { %v1515_v10 = vld [vmem:[%s1773_s29 + $0x38] sm:$0xff]  ;;  %v1509_v12 = vld [vmem:[%s1773_s29 + $0x8] sm:$0xff]  ;;  %v1520_v13 = vld [vmem:[%s1773_s29 + $0x60] sm:$0xff] }
  0x15   : > { %v1516_v14 = vld [vmem:[%s1773_s29 + $0x40] sm:$0xff]  ;;  %v1514_v15 = vld [vmem:[%s1773_s29 + $0x30] sm:$0xff]  ;;  %v1521_v17 = vld [vmem:[%s1773_s29 + $0x68] sm:$0xff] }
  0x16   : > { %427 = vmatpush.bf16.msra.mxu0 %v1524_v7  ;;  %1531 = vmatpush.bf16.msra.mxu3 %v1524_v7  ;;  %v1510_v16 = vld [vmem:[%s1773_s29 + $0x10] sm:$0xff]  ;;  %v1517_v18 = vld [vmem:[%s1773_s29 + $0x48] sm:$0xff]  ;;  %v1511_v19 = vld [vmem:[%s1773_s29 + $0x18] sm:$0xff] }
  0x17   : > { %1530 = vmatpush.bf16.msra.mxu2 %v1524_v7  ;;  %1529 = vmatpush.bf16.msra.mxu1 %v1524_v7  ;;  %v1522_v20 = vld [vmem:[%s1773_s29 + $0x70] sm:$0xff]  ;;  %v1512_v22 = vld [vmem:[%s1773_s29 + $0x20] sm:$0xff]  ;;  %v1523_v23 = vld [vmem:[%s1773_s29 + $0x78] sm:$0xff] }
  0x18   : > { %v1518_v21 = vld [vmem:[%s1773_s29 + $0x50] sm:$0xff] }
  0x19   : > { %1453 = vmatmul.msk.bf16.vlgmr.msra.gmra.mxu0 %vm364_vm2, %v1508_v8  ;;  %1464 = vmatmul.msk.bf16.vlgmr.msra.gmra.mxu3 %vm364_vm2, %v1519_v9 }
  0x1a   : > { %1460 = vmatmul.msk.bf16.vlgmr.msra.gmra.mxu2 %vm364_vm2, %v1515_v10  ;;  %1458 = vmatmul.msk.bf16.vlgmr.msra.gmra.mxu1 %vm364_vm2, %v1513_v11 }
  0x29   : > { %1454 = vmatmul.msk.bf16.gmra.mxu0 %vm364_vm2, %v1509_v12  ;;  %1465 = vmatmul.msk.bf16.gmra.mxu3 %vm364_vm2, %v1520_v13 }
  0x2a   : > { %1461 = vmatmul.msk.bf16.gmra.mxu2 %vm364_vm2, %v1516_v14  ;;  %1459 = vmatmul.msk.bf16.gmra.mxu1 %vm364_vm2, %v1514_v15 }
  0x39   : > { %1455 = vmatmul.msk.bf16.gmra.mxu0 %vm364_vm2, %v1510_v16  ;;  %1466 = vmatmul.msk.bf16.gmra.mxu3 %vm364_vm2, %v1521_v17 }
  0x3a   : > { %1462 = vmatmul.msk.bf16.gmra.mxu2 %vm364_vm2, %v1517_v18 }
  0x49   : > { %1456 = vmatmul.msk.bf16.gmra.mxu0 %vm364_vm2, %v1511_v19  ;;  %1467 = vmatmul.msk.bf16.gmra.mxu3 %vm364_vm2, %v1522_v20 }
  0x4a   : > { %1463 = vmatmul.msk.bf16.gmra.mxu2 %vm364_vm2, %v1518_v21 }
  0x59   : > { %1457 = vmatmul.msk.bf16.gmra.mxu0 %vm364_vm2, %v1512_v22  ;;  %1468 = vmatmul.msk.bf16.gmra.mxu3 %vm364_vm2, %v1523_v23 }
  0x96   : > { %v429_v25 = vpop.f32.mrf.mxu0 }
  0x97   : > { %v1813_v26 = vadd.f32 %v1810_v24, %v429_v25  ;;  %v454_v27 = vpop.f32.mrf.mxu1 }
  0x98   : > { %v1828_v38 = vadd.f32 %v1810_v24, %v454_v27 }
  0x99   : > { %2917 = vst [vmem:[#allocation2_spill] sm:$0xff] %v1813_v26  ;;  %v1469_v28 = vmul.f32 -1.442695, %v1813_v26 }
  0x9a   : > { %v1479_v41 = vmul.f32 -1.442695, %v1828_v38 }
  0x9b   : > { %1560 = vpow2.f32 %v1469_v28 }
  0x9c   : > { %v484_v29 = vpop.f32.mrf.mxu3 }
  0x9d   : > { %v1817_v30 = vadd.f32 %v1810_v24, %v484_v29  ;;  %v464_v31 = vpop.f32.mrf.mxu2 }
  0x9e   : > { %v431_v32 = vpop.f32.mrf.mxu0  ;;  %v1820_v33 = vadd.f32 %v1810_v24, %v464_v31 }
  0x9f   : > { %2918 = vst [vmem:[#allocation3_spill] sm:$0xff] %v1817_v30  ;;  %v1491_v34 = vmul.f32 -1.442695, %v1817_v30  ;;  %v1824_v35 = vadd.f32 %v1810_v24, %v431_v32  ;;  %v456_v36 = vpop.f32.mrf.mxu1 }
  0xa0   : > { %v1483_v37 = vmul.f32 -1.442695, %v1820_v33  ;;  %v1831_v39 = vadd.f32 %v1810_v24, %v456_v36 }
  0xa1   : > { %1562 = vpow2.f32 %v1491_v34  ;;  %v1470_v40 = vmul.f32 -1.442695, %v1824_v35  ;;  %v1561_v43 = vpop.eup %1560 }
  0xa2   : > { %1564 = vpow2.f32 %v1483_v37  ;;  %v1480_v42 = vmul.f32 -1.442695, %v1831_v39  ;;  %v1839_v47 = vadd.f32 1.0, %v1561_v43 }
  0xa3   : > { %1566 = vpow2.f32 %v1470_v40 }
  0xa4   : > { %v486_v44 = vpop.f32.mrf.mxu3  ;;  %1568 = vpow2.f32 %v1479_v41 }
  0xa5   : > { %v1837_v45 = vadd.f32 %v1810_v24, %v486_v44  ;;  %v466_v46 = vpop.f32.mrf.mxu2  ;;  %1570 = vpow2.f32 %v1480_v42 }
  0xa6   : > { %v434_v48 = vpop.f32.mrf.mxu0  ;;  %v1842_v49 = vadd.f32 %v1810_v24, %v466_v46  ;;  %1572 = vrcp.f32 %v1839_v47 }
  0xa7   : > { %2919 = vst [vmem:[#allocation4_spill] sm:$0xff] %v1837_v45  ;;  %v1563_v50 = vpop.eup %1562  ;;  %v1492_v51 = vmul.f32 -1.442695, %v1837_v45  ;;  %v1846_v52 = vadd.f32 %v1810_v24, %v434_v48  ;;  %v459_v53 = vpop.f32.mrf.mxu1 }
  0xa8   : > { %v1565_v54 = vpop.eup %1564  ;;  %v1484_v58 = vmul.f32 -1.442695, %v1842_v49  ;;  %v1853_v60 = vadd.f32 1.0, %v1563_v50  ;;  %v1867_v5 = vadd.f32 %v1810_v24, %v459_v53 }
  0xa9   : > { %v1567_v55 = vpop.eup %1566  ;;  %v1471_v56 = vmul.f32 -1.442695, %v1846_v52  ;;  %v1849_v57 = vadd.f32 1.0, %v1565_v54  ;;  %1574 = vpow2.f32 %v1492_v51 }
  0xaa   : > { %v1569_v59 = vpop.eup %1568  ;;  %2920 = vst [vmem:[#allocation5_spill] sm:$0xff] %v1853_v60  ;;  %v1855_v62 = vadd.f32 1.0, %v1567_v55  ;;  %v1481_v15 = vmul.f32 -1.442695, %v1867_v5 }
  0xab   : > { %v1571_v61 = vpop.eup %1570  ;;  %1576 = vpow2.f32 %v1471_v56  ;;  %v1861_v3 = vadd.f32 1.0, %v1569_v59  ;;  %v856_v22 = vand.u32 2147483647, %v1849_v57  ;;  %v858_v29 = vand.u32 2147483648, %v1849_v57 }
  0xac   : > { %v489_v63 = vpop.f32.mrf.mxu3  ;;  %1578 = vrcp.f32 %v1849_v57  ;;  %v1874_v8 = vadd.f32 1.0, %v1571_v61  ;;  %v1876_v10 = vpop.eup %1572  ;;  %vm852_vm3 = vweird.f32 %v1849_v57 }
  0xad   : > { %v1858_v0 = vadd.f32 %v1810_v24, %v489_v63  ;;  %v469_v1 = vpop.f32.mrf.mxu2  ;;  %1580 = vpow2.f32 %v1484_v58  ;;  %vm1933_vm6 = vcmp.eq.f32.partialorder %v856_v22, 8.507059e+37  ;;  %v859_v59 = vor.u32 1.1754944e-38, %v858_v29 }
  0xae   : > { %v436_v2 = vpop.f32.mrf.mxu0  ;;  %v1864_v4 = vadd.f32 %v1810_v24, %v469_v1  ;;  %1582 = vrcp.f32 %v1853_v60  ;;  %vm807_vm11 = vweird.f32 %v1874_v8 }
  0xaf   : > { %2921 = vst [vmem:[#allocation6_spill] sm:$0xff] %v1858_v0  ;;  %v1493_v6 = vmul.f32 -1.442695, %v1858_v0  ;;  %v1872_v7 = vadd.f32 %v1810_v24, %v436_v2  ;;  %v461_v9 = vpop.f32.mrf.mxu1  ;;  %1584 = vrcp.f32 %v1855_v62  ;;  %v1575_v11 = vpop.eup %1574 }
  0xb0   : > { %2922 = vst [vmem:[#allocation7_spill] sm:$0xff] %v1864_v4  ;;  %v1485_v13 = vmul.f32 -1.442695, %v1864_v4  ;;  %v1884_v16 = vadd.f32 %v1810_v24, %v461_v9  ;;  %v1889_v19 = vadd.f32 1.0, %v1575_v11 }
  0xb1   : > { %1586 = vpow2.f32 %v1493_v6  ;;  %v1472_v12 = vmul.f32 -1.442695, %v1872_v7  ;;  %v1577_v14 = vpop.eup %1576 }
  0xb2   : > { %1588 = vrcp.f32 %v1861_v3  ;;  %v1886_v17 = vpop.eup %1578  ;;  %2923 = vst [vmem:[#allocation8_spill] sm:$0xff] %v1889_v19  ;;  %v1482_v36 = vmul.f32 -1.442695, %v1884_v16  ;;  %v1908_v41 = vadd.f32 1.0, %v1577_v14 }
  0xb3   : > { %1590 = vrcp.f32 %v1874_v8  ;;  %v1581_v18 = vpop.eup %1580  ;;  %v848_v21 = vmul.f32 %v1886_v17, %v1849_v57  ;;  %vm853_vm4 = vweird.f32 %v1886_v17 }
  0xb4   : > { %1592 = vpow2.f32 %v1472_v12  ;;  %v491_v20 = vpop.f32.mrf.mxu3  ;;  %v1894_v23 = vpop.eup %1582  ;;  %v1899_v27 = vadd.f32 1.0, %v1581_v18  ;;  %vm1929_vm5 = vmor %vm852_vm3, %vm853_vm4 }
  0xb5   : > { %2924 = vst [vmem:[#allocation9_spill] sm:$0xff] %v1894_v23  ;;  %v1897_v25 = vadd.f32 %v1810_v24, %v491_v20  ;;  %1594 = vpow2.f32 %v1485_v13  ;;  %v471_v28 = vpop.f32.mrf.mxu2  ;;  %v1902_v31 = vpop.eup %1584  ;;  %v849_v37 = vsub.f32 1.0, %v848_v21 }
  0xb6   : > { %v439_v32 = vpop.f32.mrf.mxu0  ;;  %v1905_v34 = vadd.f32 %v1810_v24, %v471_v28  ;;  %1596 = vpow2.f32 %v1481_v15  ;;  %vm867_vm7 = vweird.f32 %v1899_v27  ;;  %v871_v1 = vand.u32 2147483647, %v1899_v27 }
  0xb7   : > { %2925 = vst [vmem:[#allocation10_spill] sm:$0xff] %v1897_v25  ;;  %v1587_v40 = vpop.eup %1586  ;;  %v1494_v42 = vmul.f32 -1.442695, %v1897_v25  ;;  %v1912_v43 = vadd.f32 %v1810_v24, %v439_v32  ;;  %1598 = vrcp.f32 %v1899_v27  ;;  %v850_v51 = vmul.f32 %v1886_v17, %v849_v37 }
  0xb8   : > { %2926 = vst [vmem:[#allocation11_spill] sm:$0xff] %v1905_v34  ;;  %v1915_v44 = vpop.eup %1588  ;;  %1600 = vrcp.f32 %v1889_v19  ;;  %v1486_v50 = vmul.f32 -1.442695, %v1905_v34  ;;  %v1925_v54 = vadd.f32 1.0, %v1587_v40  ;;  %v873_v13 = vand.u32 2147483648, %v1899_v27 }
  0xb9   : > { %v1920_v46 = vpop.eup %1590  ;;  %1602 = vpow2.f32 %v1494_v42  ;;  %v1473_v48 = vmul.f32 -1.442695, %v1912_v43  ;;  %v851_v56 = vadd.f32 %v1886_v17, %v850_v51  ;;  %v1941_v2 = vmul.f32 %v1915_v44, %v1861_v3 }
  0xba   : > { %v1593_v53 = vpop.eup %1592  ;;  %2927 = vst [vmem:[#allocation12_spill] sm:$0xff] %v1925_v54  ;;  %1604 = vpow2.f32 %v1482_v36  ;;  %v1965_v32 = vmul.f32 %v1920_v46, %v1874_v8  ;;  %vm1980_vm9 = vcmp.eq.f32.partialorder %v871_v1, 8.507059e+37  ;;  %v874_v57 = vor.u32 1.1754944e-38, %v873_v13 }
  0xbb   : > { %v1595_v55 = vpop.eup %1594  ;;  %1606 = vrcp.f32 %v1908_v41  ;;  %v1952_v15 = vadd.f32 1.0, %v1593_v53  ;;  %v855_v21 = vsel %vm1929_vm5, %v1886_v17, %v851_v56  ;;  %vm808_vm12 = vweird.f32 %v1920_v46 }
  0xbc   : > { %v1597_v61 = vpop.eup %1596  ;;  %1608 = vpow2.f32 %v1473_v48  ;;  %v494_v63 = vpop.f32.mrf.mxu3  ;;  %v1967_v37 = vadd.f32 1.0, %v1595_v55  ;;  %v860_v51 = vsel %vm1933_vm6, %v859_v59, %v855_v21  ;;  %v804_v58 = vsub.f32 1.0, %v1965_v32  ;;  %vm2085_vm2 = vmor %vm807_vm11, %vm808_vm12 }
  0xbd   : > { %v1599_v6 = vpop.eup %1598  ;;  %v1944_v9 = vadd.f32 %v1810_v24, %v494_v63  ;;  %1610 = vpow2.f32 %v1486_v50  ;;  %v1946_v11 = vadd.f32 1.0, %v1597_v61  ;;  %v474_v12 = vpop.f32.mrf.mxu2 }
  0xbe   : > { %v1949_v14 = vpop.eup %1600  ;;  %1612 = vrcp.f32 %v1925_v54  ;;  %v441_v18 = vpop.f32.mrf.mxu0  ;;  %v863_v20 = vmul.f32 %v1599_v6, %v1899_v27  ;;  %2933 = vst [vmem:[#allocation14_spill] sm:$0xff] %v1967_v37  ;;  %v1970_v40 = vadd.f32 %v1810_v24, %v474_v12  ;;  %vm868_vm8 = vweird.f32 %v1599_v6 }
  0xbf   : > { %2932 = vst [vmem:[#allocation13_spill] sm:$0xff] %v1949_v14  ;;  %v1603_v22 = vpop.eup %1602  ;;  %v1495_v28 = vmul.f32 -1.442695, %v1944_v9  ;;  %v1960_v29 = vadd.f32 %v1810_v24, %v441_v18  ;;  %1614 = vrcp.f32 %v1946_v11  ;;  %vm1988_vm10 = vmor %vm867_vm7, %vm868_vm8  ;;  %v2000_v27 = vmul.f32 %v860_v51, %v1820_v33 }
  0xc0   : > { %v1605_v36 = vpop.eup %1604  ;;  %2934 = vst [vmem:[#allocation15_spill] sm:$0xff] %v1970_v40  ;;  %v864_v42 = vsub.f32 1.0, %v863_v20  ;;  %v1974_v48 = vadd.f32 1.0, %v1603_v22  ;;  %v1487_v13 = vmul.f32 -1.442695, %v1970_v40  ;;  %vm822_vm14 = vweird.f32 %v1946_v11 }
  0xc1   : > { %v1972_v17 = vpop.eup %1606  ;;  %1616 = vpow2.f32 %v1495_v28  ;;  %v1474_v50 = vmul.f32 -1.442695, %v1960_v29  ;;  %v1984_v63 = vadd.f32 1.0, %v1605_v36  ;;  %2940 = vst [vmem:[#allocation17_spill] sm:$0xff] %v2000_v27  ;;  %vm792_vm7 = vweird.f32 %v1861_v3 }
  0xc2   : > { %v1609_v53 = vpop.eup %1608  ;;  %1618 = vrcp.f32 %v1952_v15  ;;  %v865_v55 = vmul.f32 %v1599_v6, %v864_v42  ;;  %vm793_vm8 = vweird.f32 %v1915_v44 }
  0xc3   : > { %v1611_v61 = vpop.eup %1610  ;;  %1620 = vpow2.f32 %v1474_v50  ;;  %v2005_v21 = vadd.f32 1.0, %v1609_v53  ;;  %v843_v33 = vand.u32 2147483648, %v1984_v63  ;;  %vm837_vm13 = vweird.f32 %v1984_v63 }
  0xc4   : > { %v1995_v59 = vpop.eup %1612  ;;  %1622 = vrcp.f32 %v1967_v37  ;;  %v496_v1 = vpop.f32.mrf.mxu3  ;;  %v866_v18 = vadd.f32 %v1599_v6, %v865_v55  ;;  %v2011_v42 = vadd.f32 1.0, %v1611_v61 }
  0xc5   : > { %2939 = vst [vmem:[#allocation16_spill] sm:$0xff] %v1995_v59  ;;  %v2002_v20 = vpop.eup %1614  ;;  %1624 = vrcp.f32 %v1974_v48  ;;  %v2008_v22 = vadd.f32 %v1810_v24, %v496_v1  ;;  %v476_v28 = vpop.f32.mrf.mxu2 }
  0xc6   : > { %v444_v36 = vpop.f32.mrf.mxu0  ;;  %2941 = vst [vmem:[#allocation18_spill] sm:$0xff] %v2011_v42  ;;  %v870_v50 = vsel %vm1988_vm10, %v1599_v6, %v866_v18  ;;  %v818_v51 = vmul.f32 %v2002_v20, %v1946_v11  ;;  %1626 = vrcp.f32 %v1984_v63  ;;  %v2025_v61 = vadd.f32 %v1810_v24, %v476_v28 }
  0xc7   : > { %v1617_v55 = vpop.eup %1616  ;;  %v2019_v53 = vadd.f32 %v1810_v24, %v444_v36  ;;  %v875_v1 = vsel %vm1980_vm9, %v874_v57, %v870_v50  ;;  %v1496_v6 = vmul.f32 -1.442695, %v2008_v22  ;;  %1628 = vpow2.f32 %v1487_v13  ;;  %vm2165_vm9 = vmor %vm792_vm7, %vm793_vm8 }
  0xc8   : > { %2942 = vst [vmem:[#allocation19_spill] sm:$0xff] %v2025_v61  ;;  %v2027_v32 = vpop.eup %1618  ;;  %v2031_v12 = vmul.f32 %v875_v1, %v1842_v49  ;;  %v819_v18 = vsub.f32 1.0, %v818_v51  ;;  %1630 = vrcp.f32 %v2005_v21  ;;  %v2035_v34 = vadd.f32 1.0, %v1617_v55 }
  0xc9   : > { %v1621_v36 = vpop.eup %1620  ;;  %v1475_v56 = vmul.f32 -1.442695, %v2019_v53  ;;  %v826_v57 = vand.u32 2147483647, %v1946_v11  ;;  %1632 = vrcp.f32 %v2011_v42  ;;  %vm823_vm15 = vweird.f32 %v2002_v20 }
  0xca   : > { %2943 = vst [vmem:[#allocation20_spill] sm:$0xff] %v2031_v12  ;;  %v2039_v28 = vpop.eup %1622  ;;  %1172 = vmatpush.msrb.mxu1 %v2031_v12  ;;  %v820_v49 = vmul.f32 %v2002_v20, %v819_v18  ;;  %v1488_v50 = vmul.f32 -1.442695, %v2025_v61  ;;  %v828_v51 = vand.u32 2147483648, %v1946_v11  ;;  %v805_v55 = vmul.f32 %v1920_v46, %v804_v58  ;;  %vm2067_vm0 = vmor %vm822_vm14, %vm823_vm15 }
  0xcb   : > { %2944 = vst [vmem:[#allocation21_spill] sm:$0xff] %v2039_v28  ;;  %v2046_v13 = vpop.eup %1624  ;;  %1634 = vpow2.f32 %v1475_v56  ;;  %v2051_v1 = vadd.f32 1.0, %v1621_v36  ;;  %v2054_v18 = vor.u32 1.1754944e-38, %v843_v33  ;;  %vm2071_vm1 = vcmp.eq.f32.partialorder %v826_v57, 8.507059e+37 }
  0xcc   : > { %1636 = vpow2.f32 %v1496_v6  ;;  %v499_v4 = vpop.f32.mrf.mxu3  ;;  %1173 = vmatpush.msrb.mxu1 %v2000_v27  ;;  %v821_v12 = vadd.f32 %v2002_v20, %v820_v49  ;;  %v2057_v40 = vpop.eup %1626  ;;  %v806_v6 = vadd.f32 %v1920_v46, %v805_v55  ;;  %v811_v57 = vand.u32 2147483647, %v1874_v8 }
  0xcd   : > { %1638 = vrcp.f32 %v2035_v34  ;;  %v2061_v56 = vadd.f32 %v1810_v24, %v499_v4  ;;  %v479_v42 = vpop.f32.mrf.mxu2  ;;  %v1629_v36 = vpop.eup %1628  ;;  %v833_v27 = vmul.f32 %v2057_v40, %v1984_v63  ;;  %v813_v55 = vand.u32 2147483648, %v1874_v8 }
  0xce   : > { %v446_v49 = vpop.f32.mrf.mxu0  ;;  %v2077_v4 = vadd.f32 %v1810_v24, %v479_v42  ;;  %v2091_v61 = vpop.eup %1630  ;;  %1640 = vpow2.f32 %v1488_v50  ;;  %v829_v37 = vor.u32 1.1754944e-38, %v828_v51  ;;  %vm838_vm3 = vweird.f32 %v2057_v40 }
  0xcf   : > { %v1497_v42 = vmul.f32 -1.442695, %v2061_v56  ;;  %v2095_v28 = vadd.f32 %v1810_v24, %v446_v49  ;;  %v2097_v30 = vpop.eup %1632  ;;  %1642 = vrcp.f32 %v2051_v1  ;;  %v834_v45 = vsub.f32 1.0, %v833_v27  ;;  %vm2118_vm4 = vmor %vm837_vm13, %vm838_vm3 }
  0xd0   : > { %2949 = vst [vmem:[#allocation22_spill] sm:$0xff] %v2077_v4  ;;  %v825_v8 = vsel %vm2067_vm0, %v2002_v20, %v821_v12  ;;  %v2105_v60 = vadd.f32 1.0, %v1629_v36  ;;  %v810_v50 = vsel %vm2085_vm2, %v1920_v46, %v806_v6  ;;  %v1489_v27 = vmul.f32 -1.442695, %v2077_v4 }
  0xd1   : > { %2952 = vst [vmem:[#allocation23_spill] sm:$0xff] %v2097_v30  ;;  %v1635_v0 = vpop.eup %1634  ;;  %1644 = vpow2.f32 %v1497_v42  ;;  %v1476_v23 = vmul.f32 -1.442695, %v2095_v28  ;;  %v835_v30 = vmul.f32 %v2057_v40, %v834_v45  ;;  %v814_v25 = vor.u32 1.1754944e-38, %v813_v55 }
  0xd2   : > { %2953 = vst [vmem:[#allocation24_spill] sm:$0xff] %v2105_v60  ;;  %v1637_v51 = vpop.eup %1636  ;;  %v2110_v49 = vadd.f32 1.0, %v1635_v0  ;;  %v830_v46 = vsel %vm2071_vm1, %v829_v37, %v825_v8  ;;  %vm2124_vm5 = vcmp.eq.f32.partialorder %v811_v57, 8.507059e+37  ;;  %v789_v12 = vsub.f32 1.0, %v1941_v2 }
  0xd3   : > { %v2114_v58 = vpop.eup %1638  ;;  %1646 = vpow2.f32 %v1476_v23  ;;  %v836_v23 = vadd.f32 %v2057_v40, %v835_v30  ;;  %v2958_v6 = vand.u32 2147483647, %v1984_v63  ;;  %v2138_v33 = vadd.f32 1.0, %v1637_v51 }
  0xd4   : > { %1648 = vrcp.f32 %v2110_v49  ;;  %v501_v45 = vpop.f32.mrf.mxu3  ;;  %v1641_v37 = vpop.eup %1640  ;;  %v790_v57 = vmul.f32 %v1915_v44, %v789_v12  ;;  %v2151_v42 = vmul.f32 %v830_v46, %v1867_v5  ;;  %v815_v8 = vsel %vm2124_vm5, %v814_v25, %v810_v50 }
  0xd5   : > { %vm2133_vm6 = vcmp.eq.f32.partialorder %v2958_v6, 8.507059e+37  ;;  %1650 = vrcp.f32 %v2105_v60  ;;  %v2142_v2 = vadd.f32 %v1810_v24, %v501_v45  ;;  %v481_v11 = vpop.f32.mrf.mxu2  ;;  %v2145_v30 = vpop.eup %1642  ;;  %v840_v55 = vsel %vm2118_vm4, %v2057_v40, %v836_v23 }
  0xd6   : > { %v449_v63 = vpop.f32.mrf.mxu0  ;;  %2961 = vst [vmem:[#allocation25_spill] sm:$0xff] %v2151_v42  ;;  %1652 = vpow2.f32 %v1489_v27  ;;  %v845_v20 = vsel %vm2133_vm6, %v2054_v18, %v840_v55  ;;  %v2169_v25 = vadd.f32 1.0, %v1641_v37  ;;  %v2172_v40 = vadd.f32 %v1810_v24, %v481_v11 }
  0xd7   : > { %v1645_v51 = vpop.eup %1644  ;;  %v1498_v45 = vmul.f32 -1.442695, %v2142_v2  ;;  %v2158_v12 = vadd.f32 %v1810_v24, %v449_v63  ;;  %v2175_v50 = vmul.f32 %v845_v20, %v1884_v16  ;;  %v791_v27 = vadd.f32 %v1915_v44, %v790_v57 }
  0xd8   : > { %2964 = vst [vmem:[#allocation26_spill] sm:$0xff] %v2169_v25  ;;  %v2180_v18 = vmul.f32 %v815_v8, %v1831_v39  ;;  %v796_v23 = vand.u32 2147483647, %v1861_v3  ;;  %v798_v6 = vand.u32 2147483648, %v1861_v3  ;;  %v2186_v37 = vadd.f32 1.0, %v1645_v51 }
  0xd9   : > { %2965 = vst [vmem:[#allocation27_spill] sm:$0xff] %v2172_v40  ;;  %v1647_v46 = vpop.eup %1646  ;;  %v1477_v0 = vmul.f32 -1.442695, %v2158_v12  ;;  %1654 = vpow2.f32 %v1498_v45  ;;  %1174 = vmatpush.msrb.mxu1 %v2175_v50  ;;  %v795_v16 = vsel %vm2165_vm9, %v1915_v44, %v791_v27  ;;  %v1490_v55 = vmul.f32 -1.442695, %v2172_v40 }
  0xda   : > { %2966 = vst [vmem:[#allocation28_spill] sm:$0xff] %v2175_v50  ;;  %v2184_v36 = vpop.eup %1648  ;;  %v2188_v11 = vadd.f32 1.0, %v1647_v46  ;;  %vm797_vm10 = vcmp.eq.f32.partialorder %v796_v23, 8.507059e+37  ;;  %v799_v39 = vor.u32 1.1754944e-38, %v798_v6  ;;  %vm732_vm11 = vweird.f32 %v2110_v49 }
  0xdb   : > { %2967 = vst [vmem:[#allocation29_spill] sm:$0xff] %v2180_v18  ;;  %v2194_v57 = vpop.eup %1650  ;;  %1656 = vpow2.f32 %v1477_v0  ;;  %v728_v3 = vmul.f32 %v2184_v36, %v2110_v49  ;;  %1175 = vmatpush.msrb.mxu1 %v2151_v42  ;;  %vm733_vm12 = vweird.f32 %v2184_v36  ;;  %vm717_vm3 = vweird.f32 %v2051_v1 }
  0xdc   : > { %2968 = vst [vmem:[#allocation30_spill] sm:$0xff] %v2194_v57  ;;  %1658 = vrcp.f32 %v2188_v11  ;;  %v504_v63 = vpop.f32.mrf.mxu3  ;;  %v1653_v8 = vpop.eup %1652  ;;  %v800_v51 = vsel %vm797_vm10, %v799_v39, %v795_v16  ;;  %v751_v39 = vand.u32 2147483647, %v2188_v11  ;;  %vm747_vm13 = vweird.f32 %v2188_v11  ;;  %vm2253_vm14 = vmor %vm732_vm11, %vm733_vm12 }
  0xdd   : > { %1660 = vrcp.f32 %v2138_v33  ;;  %v2203_v44 = vadd.f32 %v1810_v24, %v504_v63  ;;  %1176 = vmatpush.msrb.mxu1 %v2180_v18  ;;  %v2208_v20 = vmul.f32 %v800_v51, %v1828_v38  ;;  %v729_v5 = vsub.f32 1.0, %v728_v3 }
  0xde   : > { %1662 = vrcp.f32 %v2169_v25  ;;  %v451_v45 = vpop.f32.mrf.mxu0  ;;  %v2215_v23 = vadd.f32 1.0, %v1653_v8  ;;  %v753_v3 = vand.u32 2147483648, %v2188_v11  ;;  %vm2258_vm0 = vcmp.eq.f32.partialorder %v751_v39, 8.507059e+37 }
  0xdf   : > { %2969 = vst [vmem:[#allocation31_spill] sm:$0xff] %v2208_v20  ;;  %1664 = vrcp.f32 %v2186_v37  ;;  %v1499_v27 = vmul.f32 -1.442695, %v2203_v44  ;;  %v2213_v46 = vadd.f32 %v1810_v24, %v451_v45  ;;  %v1655_v0 = vpop.eup %1654  ;;  %1177 = vmatpush.msrb.mxu1 %v2208_v20  ;;  %v730_v6 = vmul.f32 %v2184_v36, %v729_v5 }
  0xe0   : > { %2970 = vst [vmem:[#allocation32_spill] sm:$0xff] %v2215_v23  ;;  %1666 = vpow2.f32 %v1490_v55  ;;  %v713_v55 = vmul.f32 %v2145_v30, %v2051_v1  ;;  %v2232_v45 = vadd.f32 1.0, %v1655_v0  ;;  %v736_v20 = vand.u32 2147483647, %v2110_v49 }
  0xe1   : > { %v1657_v16 = vpop.eup %1656  ;;  %1668 = vpow2.f32 %v1499_v27  ;;  %v1478_v38 = vmul.f32 -1.442695, %v2213_v46  ;;  %v738_v27 = vand.u32 2147483648, %v2110_v49  ;;  %v731_v42 = vadd.f32 %v2184_v36, %v730_v6 }
  0xe2   : > { %v2222_v63 = vpop.eup %1658  ;;  %v2224_v51 = vadd.f32 1.0, %v1657_v16  ;;  %vm2270_vm1 = vcmp.eq.f32.partialorder %v736_v20, 8.507059e+37  ;;  %vm718_vm4 = vweird.f32 %v2145_v30 }
  0xe3   : > { %v2230_v8 = vpop.eup %1660  ;;  %1670 = vpow2.f32 %v1478_v38  ;;  %v743_v5 = vmul.f32 %v2222_v63, %v2188_v11  ;;  %vm748_vm15 = vweird.f32 %v2222_v63  ;;  %v739_v40 = vor.u32 1.1754944e-38, %v738_v27  ;;  %vm2310_vm7 = vmor %vm717_vm3, %vm718_vm4 }
  0xe4   : > { %v2237_v50 = vpop.eup %1662  ;;  %1672 = vrcp.f32 %v2224_v51  ;;  %v506_v16 = vpop.f32.mrf.mxu3  ;;  %v735_v25 = vsel %vm2253_vm14, %v2184_v36, %v731_v42  ;;  %v766_v14 = vand.u32 2147483647, %v2224_v51  ;;  %vm2283_vm2 = vmor %vm747_vm13, %vm748_vm15  ;;  %vm762_vm5 = vweird.f32 %v2224_v51 }
  0xe5   : > { %2971 = vst [vmem:[#allocation33_spill] sm:$0xff] %v2237_v50  ;;  %v2242_v18 = vpop.eup %1664  ;;  %1674 = vrcp.f32 %v2215_v23  ;;  %v2246_v0 = vadd.f32 %v1810_v24, %v506_v16  ;;  %v744_v38 = vsub.f32 1.0, %v743_v5  ;;  %v754_v24 = vor.u32 1.1754944e-38, %v753_v3 }
  0xe6   : > { %v1667_v6 = vpop.eup %1666  ;;  %v714_v16 = vsub.f32 1.0, %v713_v55  ;;  %1676 = vrcp.f32 %v2232_v45  ;;  %v768_v11 = vand.u32 2147483648, %v2224_v51  ;;  %vm2317_vm8 = vcmp.eq.f32.partialorder %v766_v14, 8.507059e+37 }
  0xe7   : > { %v1669_v5 = vpop.eup %1668  ;;  %v1500_v60 = vmul.f32 -1.442695, %v2246_v0  ;;  %v745_v49 = vmul.f32 %v2222_v63, %v744_v38  ;;  %v2275_v23 = vadd.f32 1.0, %v1667_v6  ;;  %v740_v38 = vsel %vm2270_vm1, %v739_v40, %v735_v25 }
  0xe8   : > { %v2265_v50 = vadd.f32 1.0, %v1669_v5  ;;  %v715_v3 = vmul.f32 %v2145_v30, %v714_v16  ;;  %v723_v5 = vand.u32 2147483648, %v2051_v1  ;;  %v721_v40 = vand.u32 2147483647, %v2051_v1 }
  0xe9   : > { %v1671_v55 = vpop.eup %1670  ;;  %1678 = vpow2.f32 %v1500_v60  ;;  %2978 = vst [vmem:[#allocation34_spill] sm:$0xff] %v2275_v23  ;;  %v746_v27 = vadd.f32 %v2222_v63, %v745_v49  ;;  %v769_v4 = vor.u32 1.1754944e-38, %v768_v11  ;;  %v2324_v19 = vmul.f32 %v740_v38, %v2019_v53 }
  0xea   : > { %v1673_v42 = vpop.eup %1672  ;;  %1680 = vrcp.f32 %v2265_v50  ;;  %v2288_v36 = vadd.f32 1.0, %v1671_v55  ;;  %v716_v16 = vadd.f32 %v2145_v30, %v715_v3  ;;  %vm722_vm12 = vcmp.eq.f32.partialorder %v721_v40, 8.507059e+37 }
  0xeb   : > { %v2292_v60 = vpop.eup %1674  ;;  %v758_v20 = vmul.f32 %v1673_v42, %v2224_v51  ;;  %v750_v6 = vsel %vm2283_vm2, %v2222_v63, %v746_v27  ;;  %vm763_vm6 = vweird.f32 %v1673_v42  ;;  %vm1092_vm13 = vweird.f32 %v2265_v50 }
  0xec   : > { %2981 = vst [vmem:[#allocation35_spill] sm:$0xff] %v2292_v60  ;;  %1682 = vrcp.f32 %v2288_v36  ;;  %v2305_v49 = vpop.eup %1676  ;;  %v781_v55 = vand.u32 2147483647, %v2288_v36  ;;  %v783_v63 = vand.u32 2147483648, %v2288_v36  ;;  %vm777_vm9 = vweird.f32 %v2288_v36  ;;  %vm2333_vm10 = vmor %vm762_vm5, %vm763_vm6 }
  0xed   : > { %v759_v60 = vsub.f32 1.0, %v758_v20  ;;  %1684 = vrcp.f32 %v2275_v23  ;;  %v755_v20 = vsel %vm2258_vm0, %v754_v24, %v750_v6  ;;  %v720_v57 = vsel %vm2310_vm7, %v2145_v30, %v716_v16 }
  0xee   : > { %v724_v24 = vor.u32 1.1754944e-38, %v723_v5  ;;  %vm2340_vm11 = vcmp.eq.f32.partialorder %v781_v55, 8.507059e+37  ;;  %v784_v51 = vor.u32 1.1754944e-38, %v783_v63  ;;  %v2348_v6 = vmul.f32 %v755_v20, %v2095_v28 }
  0xef   : > { %v1679_v3 = vpop.eup %1678  ;;  %v760_v27 = vmul.f32 %v1673_v42, %v759_v60  ;;  %v698_v30 = vmul.f32 %v2091_v61, %v2005_v21  ;;  %v1096_v55 = vand.u32 2147483647, %v2265_v50  ;;  %vm702_vm15 = vweird.f32 %v2005_v21 }
  0xf0   : > { %v2326_v26 = vpop.eup %1680  ;;  %v2328_v1 = vadd.f32 1.0, %v1679_v3  ;;  %v2360_v63 = vsel %vm722_vm12, %v724_v24, %v720_v57  ;;  %v1098_v3 = vand.u32 2147483648, %v2265_v50  ;;  %vm703_vm0 = vweird.f32 %v2091_v61 }
  0xf1   : > { %v761_v60 = vadd.f32 %v1673_v42, %v760_v27  ;;  %v1088_v11 = vmul.f32 %v2326_v26, %v2265_v50  ;;  %vm1093_vm1 = vweird.f32 %v2326_v26  ;;  %v706_v57 = vand.u32 2147483647, %v2005_v21  ;;  %vm2395_vm5 = vmor %vm702_vm15, %vm703_vm0 }
  0xf2   : > { %v1683_v38 = vpop.eup %1682  ;;  %1686 = vrcp.f32 %v2328_v1  ;;  %v1111_v40 = vand.u32 2147483647, %v2328_v1  ;;  %v708_v24 = vand.u32 2147483648, %v2005_v21  ;;  %vm1107_vm3 = vweird.f32 %v2328_v1  ;;  %vm2403_vm6 = vmor %vm1092_vm13, %vm1093_vm1 }
  0xf3   : > { %v773_v16 = vmul.f32 %v1683_v38, %v2288_v36  ;;  %v765_v5 = vsel %vm2333_vm10, %v1673_v42, %v761_v60  ;;  %v2357_v25 = vpop.eup %1684  ;;  %v1089_v28 = vsub.f32 1.0, %v1088_v11  ;;  %vm778_vm14 = vweird.f32 %v1683_v38 }
  0xf4   : > { %2990 = vst [vmem:[#allocation36_spill] sm:$0xff] %v2357_v25  ;;  %v770_v20 = vsel %vm2317_vm8, %v769_v4, %v765_v5  ;;  %v1113_v42 = vand.u32 2147483648, %v2328_v1  ;;  %v699_v60 = vsub.f32 1.0, %v698_v30  ;;  %vm2374_vm2 = vmor %vm777_vm9, %vm778_vm14  ;;  %vm2387_vm4 = vcmp.eq.f32.partialorder %v1111_v40, 8.507059e+37 }
  0xf5   : > { %v774_v27 = vsub.f32 1.0, %v773_v16  ;;  %v1090_v14 = vmul.f32 %v2326_v26, %v1089_v28  ;;  %v1073_v16 = vmul.f32 %v2305_v49, %v2232_v45  ;;  %v2384_v28 = vmul.f32 %v770_v20, %v2158_v12 }
  0xf6   : > { %v700_v30 = vmul.f32 %v2091_v61, %v699_v60  ;;  %v1114_v23 = vor.u32 1.1754944e-38, %v1113_v42  ;;  %vm2408_vm7 = vcmp.eq.f32.partialorder %v706_v57, 8.507059e+37  ;;  %v709_v59 = vor.u32 1.1754944e-38, %v708_v24 }
  0xf7   : > { %v775_v25 = vmul.f32 %v1683_v38, %v774_v27  ;;  %v1091_v4 = vadd.f32 %v2326_v26, %v1090_v14  ;;  %v1074_v21 = vsub.f32 1.0, %v1073_v16  ;;  %vm1078_vm8 = vweird.f32 %v2305_v49 }
  0xf8   : > { %v1687_v11 = vpop.eup %1686  ;;  %v701_v40 = vadd.f32 %v2091_v61, %v700_v30  ;;  %v1081_v30 = vand.u32 2147483647, %v2232_v45  ;;  %vm1097_vm10 = vcmp.eq.f32.partialorder %v1096_v55, 8.507059e+37  ;;  %v1083_v53 = vand.u32 2147483648, %v2232_v45 }
  0xf9   : > { %v776_v5 = vadd.f32 %v1683_v38, %v775_v25  ;;  %v1103_v27 = vmul.f32 %v1687_v11, %v2328_v1  ;;  %v1099_v25 = vor.u32 1.1754944e-38, %v1098_v3  ;;  %v1095_v50 = vsel %vm2403_vm6, %v2326_v26, %v1091_v4 }
  0xfa   : > { %v705_v3 = vsel %vm2395_vm5, %v2091_v61, %v701_v40  ;;  %v1075_v57 = vmul.f32 %v2305_v49, %v1074_v21  ;;  %vm1108_vm9 = vweird.f32 %v1687_v11  ;;  %vm1082_vm14 = vcmp.eq.f32.partialorder %v1081_v30, 8.507059e+37 }
  0xfb   : > { %v780_v42 = vsel %vm2374_vm2, %v1683_v38, %v776_v5  ;;  %v1104_v60 = vsub.f32 1.0, %v1103_v27  ;;  %v710_v24 = vsel %vm2408_vm7, %v709_v59, %v705_v3  ;;  %vm1109_vm13 = vmor %vm1107_vm3, %vm1108_vm9  ;;  %v1084_v55 = vor.u32 1.1754944e-38, %v1083_v53 }
  0xfc   : > { %v785_v54 = vsel %vm2340_vm11, %v784_v51, %v780_v42  ;;  %v1076_v26 = vadd.f32 %v2305_v49, %v1075_v57  ;;  %vm1077_vm11 = vweird.f32 %v2232_v45  ;;  %v1100_v51 = vsel %vm1097_vm10, %v1099_v25, %v1095_v50  ;;  %v3016_v25 = vld [vmem:[#allocation10_spill] sm:$0xff] }
  0xfd   : > { %v2425_v39 = vmul.f32 %v785_v54, %v2213_v46  ;;  %v1105_v38 = vmul.f32 %v1687_v11, %v1104_v60  ;;  %vm1079_vm12 = vmor %vm1077_vm11, %vm1078_vm8  ;;  %v683_v54 = vmul.f32 %v2027_v32, %v1952_v15  ;;  %vm687_vm15 = vweird.f32 %v1952_v15 }
  0xfe   : > { %v1080_v46 = vsel %vm1079_vm12, %v2305_v49, %v1076_v26  ;;  %vm688_vm0 = vweird.f32 %v2027_v32  ;;  %v691_v59 = vand.u32 2147483647, %v1952_v15  ;;  %v693_v1 = vand.u32 2147483648, %v1952_v15 }
  0xff   : > { %1178 = vmatpush.msrb.mxu1 %v2425_v39  ;;  %v1106_v61 = vadd.f32 %v1687_v11, %v1105_v38  ;;  %v684_v4 = vsub.f32 1.0, %v683_v54  ;;  %v1085_v5 = vsel %vm1082_vm14, %v1084_v55, %v1080_v46  ;;  %v1058_v49 = vmul.f32 %v2242_v18, %v2186_v37  ;;  %vm2467_vm1 = vmor %vm687_vm15, %vm688_vm0 }
 0x100   : > { %v2451_v27 = vmul.f32 %v2324_v19, %v2324_v19  ;;  %v1122_v14 = vmul.f32 %v2360_v63, %v1960_v29  ;;  %v2460_v36 = vmul.f32 %v1100_v51, %v2203_v44  ;;  %v2463_v12 = vmul.f32 %v710_v24, %v1912_v43 }
 0x101   : > { %1179 = vmatpush.msrb.mxu1 %v2384_v28  ;;  %v1110_v45 = vsel %vm1109_vm13, %v1687_v11, %v1106_v61  ;;  %v694_v40 = vor.u32 1.1754944e-38, %v693_v1  ;;  %v2474_v29 = vmul.f32 %v1085_v5, %v2142_v2  ;;  %vm692_vm2 = vcmp.eq.f32.partialorder %v691_v59, 8.507059e+37 }
 0x102   : > { %v1115_v16 = vsel %vm2387_vm4, %v1114_v23, %v1110_v45  ;;  %v685_v23 = vmul.f32 %v2027_v32, %v684_v4  ;;  %vm1063_vm3 = vweird.f32 %v2242_v18  ;;  %v1066_v15 = vand.u32 2147483647, %v2186_v37 }
 0x103   : > { %1180 = vmatpush.msrb.mxu1 %v2348_v6  ;;  %v2454_v11 = vmul.f32 %v1115_v16, %v2246_v0  ;;  %v1059_v0 = vsub.f32 1.0, %v1058_v49  ;;  %v1068_v63 = vand.u32 2147483648, %v2186_v37  ;;  %v668_v20 = vmul.f32 %v1972_v17, %v1908_v41 }
 0x104   : > { %v686_v44 = vadd.f32 %v2027_v32, %v685_v23  ;;  %vm1062_vm4 = vweird.f32 %v2186_v37  ;;  %vm672_vm5 = vweird.f32 %v1908_v41  ;;  %vm673_vm6 = vweird.f32 %v1972_v17 }
 0x105   : > { %1181 = vmatpush.msrb.mxu1 %v2324_v19  ;;  %1192 = vmatpush.msrb.mxu2 %v2454_v11  ;;  %v1060_v43 = vmul.f32 %v2242_v18, %v1059_v0  ;;  %v669_v42 = vsub.f32 1.0, %v668_v20  ;;  %v676_v60 = vand.u32 2147483647, %v1908_v41  ;;  %vm1064_vm7 = vmor %vm1062_vm4, %vm1063_vm3  ;;  %v678_v37 = vand.u32 2147483648, %v1908_v41 }
 0x106   : > { %v690_v19 = vsel %vm2467_vm1, %v2027_v32, %v686_v44  ;;  %v1069_v32 = vor.u32 1.1754944e-38, %v1068_v63  ;;  %v1043_v3 = vmul.f32 %v2230_v8, %v2138_v33  ;;  %v2502_v57 = vmul.f32 %v2348_v6, %v2348_v6  ;;  %vm2512_vm9 = vmor %vm672_vm5, %vm673_vm6 }
 0x107   : > { %1182 = vmatpush.msrb.mxu1 %v1122_v14  ;;  %1193 = vmatpush.msrb.mxu2 %v2460_v36  ;;  %v695_v2 = vsel %vm692_vm2, %v694_v40, %v690_v19  ;;  %v1061_v21 = vadd.f32 %v2242_v18, %v1060_v43  ;;  %vm1067_vm8 = vcmp.eq.f32.partialorder %v1066_v15, 8.507059e+37  ;;  %v670_v30 = vmul.f32 %v1972_v17, %v669_v42 }
 0x108   : > { %v1120_v50 = vmul.f32 %v695_v2, %v1872_v7  ;;  %v2506_v26 = vmul.f32 %v1122_v14, %v1122_v14  ;;  %v679_v61 = vor.u32 1.1754944e-38, %v678_v37  ;;  %v1044_v6 = vsub.f32 1.0, %v1043_v3 }
 0x109   : > { %1183 = vmatpush.msrb.mxu1 %v2463_v12  ;;  %1194 = vmatpush.msrb.mxu2 %v2474_v29  ;;  %v1065_v38 = vsel %vm1064_vm7, %v2242_v18, %v1061_v21  ;;  %v671_v18 = vadd.f32 %v1972_v17, %v670_v30  ;;  %vm677_vm10 = vcmp.eq.f32.partialorder %v676_v60, 8.507059e+37  ;;  %v1053_v24 = vand.u32 2147483648, %v2138_v33 }
 0x10a   : > { %v1070_v7 = vsel %vm1067_vm8, %v1069_v32, %v1065_v38  ;;  %v1045_v54 = vmul.f32 %v2230_v8, %v1044_v6  ;;  %vm1048_vm11 = vweird.f32 %v2230_v8  ;;  %v1051_v41 = vand.u32 2147483647, %v2138_v33  ;;  %v3011_v6 = vld [vmem:[#allocation12_spill] sm:$0xff] }
 0x10b   : > { %1184 = vmatpush.msrb.mxu1 %v1120_v50  ;;  %v2517_v51 = vmul.f32 %v1070_v7, %v2061_v56  ;;  %v653_v46 = vmul.f32 %v1902_v31, %v1855_v62  ;;  %v675_v56 = vsel %vm2512_vm9, %v1972_v17, %v671_v18  ;;  %vm1047_vm12 = vweird.f32 %v2138_v33  ;;  %v3012_v18 = vld [vmem:[#allocation16_spill] sm:$0xff] }
 0x10c   : > { %vm657_vm13 = vweird.f32 %v1855_v62  ;;  %vm658_vm14 = vweird.f32 %v1902_v31  ;;  %v680_v55 = vsel %vm677_vm10, %v679_v61, %v675_v56  ;;  %v1046_v45 = vadd.f32 %v2230_v8, %v1045_v54  ;;  %vm1049_vm15 = vmor %vm1047_vm12, %vm1048_vm11  ;;  %v3013_v56 = vld [vmem:[#allocation2_spill] sm:$0xff] }
 0x10d   : > { %1195 = vmatpush.msrb.mxu2 %v2517_v51  ;;  %v654_v4 = vsub.f32 1.0, %v653_v46  ;;  %v661_v59 = vand.u32 2147483647, %v1855_v62  ;;  %v1119_v16 = vmul.f32 %v680_v55, %v1846_v52  ;;  %v1054_v5 = vor.u32 1.1754944e-38, %v1053_v24  ;;  %vm2551_vm1 = vmor %vm657_vm13, %vm658_vm14 }
 0x10e   : > { %v663_v1 = vand.u32 2147483648, %v1855_v62  ;;  %v1028_v17 = vmul.f32 %v2114_v58, %v2035_v34  ;;  %v2541_v33 = vmul.f32 %v2463_v12, %v2463_v12  ;;  %v1050_v49 = vsel %vm1049_vm15, %v2230_v8, %v1046_v45 }
 0x10f   : > { %vm1052_vm0 = vcmp.eq.f32.partialorder %v1051_v41, 8.507059e+37  ;;  %v655_v14 = vmul.f32 %v1902_v31, %v654_v4  ;;  %v2545_v23 = vmul.f32 %v1120_v50, %v1120_v50  ;;  %1185 = vmatpush.msrb.mxu1 %v1119_v16  ;;  %vm662_vm2 = vcmp.eq.f32.partialorder %v661_v59, 8.507059e+37  ;;  %v3014_v59 = vld [vmem:[#allocation8_spill] sm:$0xff] }
 0x110   : > { %v1055_v52 = vsel %vm1052_vm0, %v1054_v5, %v1050_v49  ;;  %v664_v40 = vor.u32 1.1754944e-38, %v663_v1  ;;  %v1029_v12 = vsub.f32 1.0, %v1028_v17  ;;  %v1038_v44 = vand.u32 2147483648, %v2035_v34 }
 0x111   : > { %v2556_v0 = vmul.f32 %v1055_v52, %v2008_v22  ;;  %v656_v8 = vadd.f32 %v1902_v31, %v655_v14  ;;  %vm1033_vm3 = vweird.f32 %v2114_v58  ;;  %v1036_v62 = vand.u32 2147483647, %v2035_v34 }
 0x112   : > { %v1030_v43 = vmul.f32 %v2114_v58, %v1029_v12  ;;  %v638_v15 = vmul.f32 %v1876_v10, %v1839_v47  ;;  %vm1032_vm4 = vweird.f32 %v2035_v34  ;;  %vm642_vm5 = vweird.f32 %v1839_v47 }
 0x113   : > { %1196 = vmatpush.msrb.mxu2 %v2556_v0  ;;  %v660_v22 = vsel %vm2551_vm1, %v1902_v31, %v656_v8  ;;  %vm643_vm6 = vweird.f32 %v1876_v10  ;;  %v646_v2 = vand.u32 2147483647, %v1839_v47  ;;  %vm1034_vm7 = vmor %vm1032_vm4, %vm1033_vm3  ;;  %v1039_v42 = vor.u32 1.1754944e-38, %v1038_v44 }
 0x114   : > { %v665_v63 = vsel %vm662_vm2, %v664_v40, %v660_v22  ;;  %v1031_v20 = vadd.f32 %v2114_v58, %v1030_v43  ;;  %v639_v19 = vsub.f32 1.0, %v638_v15  ;;  %v648_v60 = vand.u32 2147483648, %v1839_v47  ;;  %vm2584_vm9 = vmor %vm642_vm5, %vm643_vm6  ;;  %v3017_v15 = vld [vmem:[#allocation5_spill] sm:$0xff] }
 0x115   : > { %v1118_v21 = vmul.f32 %v665_v63, %v1824_v35  ;;  %v1013_v31 = vmul.f32 %v2046_v13, %v1974_v48  ;;  %v1218_v34 = vmul.f32 %v1119_v16, %v1119_v16  ;;  %vm1037_vm8 = vcmp.eq.f32.partialorder %v1036_v62, 8.507059e+37  ;;  %v3015_v16 = vld [vmem:[#allocation13_spill] sm:$0xff] }
 0x116   : > { %v1035_v50 = vsel %vm1034_vm7, %v2114_v58, %v1031_v20  ;;  %v640_v32 = vmul.f32 %v1876_v10, %v639_v19  ;;  %vm2588_vm10 = vcmp.eq.f32.partialorder %v646_v2, 8.507059e+37  ;;  %v649_v38 = vor.u32 1.1754944e-38, %v648_v60  ;;  %v3018_v22 = vld [vmem:[#allocation9_spill] sm:$0xff] }
 0x117   : > { %1186 = vmatpush.msrb.mxu1 %v1118_v21  ;;  %v1040_v37 = vsel %vm1037_vm8, %v1039_v42, %v1035_v50  ;;  %v1014_v30 = vsub.f32 1.0, %v1013_v31  ;;  %v1021_v53 = vand.u32 2147483647, %v1974_v48  ;;  %v1023_v61 = vand.u32 2147483648, %v1974_v48  ;;  %v3021_v50 = vld [vmem:[#allocation6_spill] sm:$0xff] }
 0x118   : > { %v2593_v58 = vmul.f32 %v1040_v37, %v1944_v9  ;;  %v641_v7 = vadd.f32 %v1876_v10, %v640_v32  ;;  %vm1017_vm11 = vweird.f32 %v1974_v48  ;;  %vm1018_vm12 = vweird.f32 %v2046_v13 }
 0x119   : > { %v1015_v47 = vmul.f32 %v2046_v13, %v1014_v30  ;;  %v998_v24 = vmul.f32 %v3012_v18, %v3011_v6  ;;  %v1217_v54 = vmul.f32 %v1118_v21, %v1118_v21  ;;  %vm1002_vm13 = vweird.f32 %v3011_v6  ;;  %vm1019_vm0 = vmor %vm1017_vm11, %vm1018_vm12  ;;  %v3022_v30 = vld [vmem:[#allocation34_spill] sm:$0xff] }
 0x11a   : > { %1197 = vmatpush.msrb.mxu2 %v2593_v58  ;;  %v645_v9 = vsel %vm2584_vm9, %v1876_v10, %v641_v7  ;;  %vm1003_vm14 = vweird.f32 %v3012_v18  ;;  %vm1022_vm15 = vcmp.eq.f32.partialorder %v1021_v53, 8.507059e+37  ;;  %v1024_v45 = vor.u32 1.1754944e-38, %v1023_v61  ;;  %v3023_v7 = vld [vmem:[#allocation36_spill] sm:$0xff] }
 0x11b   : > { %v650_v41 = vsel %vm2588_vm10, %v649_v38, %v645_v9  ;;  %v1016_v48 = vadd.f32 %v2046_v13, %v1015_v47  ;;  %v999_v46 = vsub.f32 1.0, %v998_v24  ;;  %v1008_v4 = vand.u32 2147483648, %v3011_v6  ;;  %vm1004_vm3 = vmor %vm1002_vm13, %vm1003_vm14 }
 0x11c   : > { %v1117_v55 = vmul.f32 %v650_v41, %v3013_v56  ;;  %v983_v10 = vmul.f32 %v3015_v16, %v3014_v59  ;;  %v1006_v17 = vand.u32 2147483647, %v3011_v6  ;;  %vm987_vm1 = vweird.f32 %v3014_v59 }
 0x11d   : > { %v1020_v5 = vsel %vm1019_vm0, %v2046_v13, %v1016_v48  ;;  %v1000_v1 = vmul.f32 %v3012_v18, %v999_v46  ;;  %vm988_vm2 = vweird.f32 %v3015_v16  ;;  %v991_v8 = vand.u32 2147483647, %v3014_v59 }
 0x11e   : > { %1187 = vmatpush.msrb.mxu1 %v1117_v55  ;;  %v1216_v49 = vmul.f32 %v1117_v55, %v1117_v55  ;;  %v1025_v14 = vsel %vm1022_vm15, %v1024_v45, %v1020_v5  ;;  %v984_v52 = vsub.f32 1.0, %v983_v10  ;;  %v993_v13 = vand.u32 2147483648, %v3014_v59  ;;  %vm989_vm6 = vmor %vm987_vm1, %vm988_vm2  ;;  %v3029_v59 = vld [vmem:[#allocation32_spill] sm:$0xff]  ;;  %v3031_v5 = vld [vmem:[#allocation3_spill] sm:$0xff] }
 0x11f   : > { %v2622_v40 = vmul.f32 %v1025_v14, %v3016_v25  ;;  %v1001_v12 = vadd.f32 %v3012_v18, %v1000_v1  ;;  %v1009_v43 = vor.u32 1.1754944e-38, %v1008_v4  ;;  %v968_v63 = vmul.f32 %v3018_v22, %v3017_v15 }
 0x120   : > { %v1248_v44 = vadd.f32 %v1217_v54, %v1216_v49  ;;  %v985_v62 = vmul.f32 %v3015_v16, %v984_v52  ;;  %vm1007_vm4 = vcmp.eq.f32.partialorder %v1006_v17, 8.507059e+37  ;;  %vm2636_vm5 = vcmp.eq.f32.partialorder %v991_v8, 8.507059e+37  ;;  %v3032_v8 = vld [vmem:[#allocation26_spill] sm:$0xff] }
 0x121   : > { %1198 = vmatpush.msrb.mxu2 %v2622_v40  ;;  %v1005_v20 = vsel %vm1004_vm3, %v3012_v18, %v1001_v12  ;;  %v994_v2 = vor.u32 1.1754944e-38, %v993_v13  ;;  %v969_v31 = vsub.f32 1.0, %v968_v63  ;;  %vm973_vm7 = vweird.f32 %v3018_v22  ;;  %v3024_v18 = vld [vmem:[#allocation4_spill] sm:$0xff]  ;;  %v3033_v13 = vld [vmem:[#allocation33_spill] sm:$0xff] }
 0x122   : > { %v1249_v21 = vadd.f32 %v1248_v44, %v1218_v34  ;;  %v1010_v42 = vsel %vm1007_vm4, %v1009_v43, %v1005_v20  ;;  %v986_v60 = vadd.f32 %v3015_v16, %v985_v62  ;;  %v976_v37 = vand.u32 2147483647, %v3017_v15 }
 0x123   : > { %v2642_v32 = vmul.f32 %v1010_v42, %v3021_v50  ;;  %v978_v35 = vand.u32 2147483648, %v3017_v15  ;;  %v970_v38 = vmul.f32 %v3018_v22, %v969_v31  ;;  %v953_v53 = vmul.f32 %v3023_v7, %v3022_v30  ;;  %v3039_v50 = vld [vmem:[#allocation24_spill] sm:$0xff] }
 0x124   : > { %v1250_v34 = vadd.f32 %v1249_v21, %v2545_v23  ;;  %v990_v3 = vsel %vm989_vm6, %v3015_v16, %v986_v60  ;;  %v1224_v61 = vmul.f32 %v2384_v28, %v2384_v28  ;;  %vm972_vm8 = vweird.f32 %v3017_v15  ;;  %v3030_v16 = vld [vmem:[#allocation35_spill] sm:$0xff] }
 0x125   : > { %1199 = vmatpush.msrb.mxu2 %v2642_v32  ;;  %v995_v47 = vsel %vm2636_vm5, %v994_v2, %v990_v3  ;;  %v979_v6 = vor.u32 1.1754944e-38, %v978_v35  ;;  %v971_v54 = vadd.f32 %v3018_v22, %v970_v38  ;;  %v954_v9 = vsub.f32 1.0, %v953_v53  ;;  %vm974_vm9 = vmor %vm972_vm8, %vm973_vm7  ;;  %v3063_v3 = vld [vmem:[#allocation28_spill] sm:$0xff] }
 0x126   : > { %v1251_v23 = vadd.f32 %v1250_v34, %v2541_v33  ;;  %v2664_v24 = vmul.f32 %v995_v47, %v3024_v18  ;;  %vm957_vm10 = vweird.f32 %v3022_v30  ;;  %vm958_vm11 = vweird.f32 %v3023_v7  ;;  %v3045_v47 = vld [vmem:[#allocation22_spill] sm:$0xff] }
 0x127   : > { %v961_v28 = vand.u32 2147483647, %v3022_v30  ;;  %v963_v41 = vand.u32 2147483648, %v3022_v30  ;;  %v975_v33 = vsel %vm974_vm9, %v3018_v22, %v971_v54  ;;  %vm977_vm12 = vcmp.eq.f32.partialorder %v976_v37, 8.507059e+37  ;;  %vm2677_vm13 = vmor %vm957_vm10, %vm958_vm11  ;;  %v3036_v22 = vld [vmem:[#allocation27_spill] sm:$0xff]  ;;  %v3040_v37 = vld [vmem:[#allocation30_spill] sm:$0xff] }
 0x128   : > { %v1252_v48 = vadd.f32 %v1251_v23, %v2506_v26  ;;  %1200 = vmatpush.msrb.mxu2 %v2664_v24  ;;  %v955_v46 = vmul.f32 %v3023_v7, %v954_v9  ;;  %v980_v56 = vsel %vm977_vm12, %v979_v6, %v975_v33  ;;  %v938_v26 = vmul.f32 %v3030_v16, %v3029_v59  ;;  %v3046_v54 = vld [vmem:[#allocation14_spill] sm:$0xff]  ;;  %v3047_v9 = vld [vmem:[#allocation21_spill] sm:$0xff] }
 0x129   : > { %vm2681_vm14 = vcmp.eq.f32.partialorder %v961_v28, 8.507059e+37  ;;  %v964_v4 = vor.u32 1.1754944e-38, %v963_v41  ;;  %v2689_v1 = vmul.f32 %v980_v56, %v3031_v5  ;;  %vm942_vm15 = vweird.f32 %v3029_v59  ;;  %v3048_v41 = vld [vmem:[#allocation29_spill] sm:$0xff] }
 0x12a   : > { %v1253_v10 = vadd.f32 %v1252_v48, %v2451_v27  ;;  %v956_v17 = vadd.f32 %v3023_v7, %v955_v46  ;;  %v939_v49 = vsub.f32 1.0, %v938_v26  ;;  %vm943_vm0 = vweird.f32 %v3030_v16 }
 0x12b   : > { %v946_v14 = vand.u32 2147483647, %v3029_v59  ;;  %v948_v52 = vand.u32 2147483648, %v3029_v59  ;;  %v1225_v25 = vmul.f32 %v2425_v39, %v2425_v39  ;;  %1201 = vmatpush.msrb.mxu2 %v2689_v1  ;;  %v923_v44 = vmul.f32 %v3033_v13, %v3032_v8  ;;  %vm2717_vm2 = vmor %vm942_vm15, %vm943_vm0  ;;  %v3053_v59 = vld [vmem:[#allocation19_spill] sm:$0xff] }
 0x12c   : > { %v1254_v12 = vadd.f32 %v1253_v10, %v2502_v57  ;;  %v960_v27 = vsel %vm2677_vm13, %v3023_v7, %v956_v17  ;;  %v940_v62 = vmul.f32 %v3030_v16, %v939_v49  ;;  %vm927_vm3 = vweird.f32 %v3032_v8  ;;  %v3054_v17 = vld [vmem:[#allocation31_spill] sm:$0xff] }
 0x12d   : > { %v965_v43 = vsel %vm2681_vm14, %v964_v4, %v960_v27  ;;  %vm2708_vm1 = vcmp.eq.f32.partialorder %v946_v14, 8.507059e+37  ;;  %v949_v39 = vor.u32 1.1754944e-38, %v948_v52  ;;  %v924_v19 = vsub.f32 1.0, %v923_v44  ;;  %v3055_v52 = vld [vmem:[#allocation18_spill] sm:$0xff] }
 0x12e   : > { %v1255_v57 = vadd.f32 %v1254_v12, %v1224_v61  ;;  %v2713_v63 = vmul.f32 %v965_v43, %v3036_v22  ;;  %v941_v2 = vadd.f32 %v3030_v16, %v940_v62  ;;  %vm928_vm4 = vweird.f32 %v3033_v13 }
 0x12f   : > { %v931_v21 = vand.u32 2147483647, %v3032_v8  ;;  %v933_v42 = vand.u32 2147483648, %v3032_v8  ;;  %v925_v31 = vmul.f32 %v3033_v13, %v924_v19  ;;  %v908_v35 = vmul.f32 %v3040_v37, %v3039_v50  ;;  %vm2733_vm5 = vmor %vm927_vm3, %vm928_vm4 }
 0x130   : > { %v1256_v60 = vadd.f32 %v1255_v57, %v1225_v25  ;;  %1202 = vmatpush.msrb.mxu2 %v2713_v63  ;;  %v945_v34 = vsel %vm2717_vm2, %v3030_v16, %v941_v2  ;;  %vm912_vm7 = vweird.f32 %v3039_v50  ;;  %vm913_vm8 = vweird.f32 %v3040_v37  ;;  %v3056_v25 = vld [vmem:[#allocation23_spill] sm:$0xff] }
 0x131   : > { %vm2737_vm6 = vcmp.eq.f32.partialorder %v931_v21, 8.507059e+37  ;;  %v934_v30 = vor.u32 1.1754944e-38, %v933_v42  ;;  %v950_v7 = vsel %vm2708_vm1, %v949_v39, %v945_v34  ;;  %v926_v53 = vadd.f32 %v3033_v13, %v925_v31  ;;  %vm2765_vm10 = vmor %vm912_vm7, %vm913_vm8  ;;  %v3061_v57 = vld [vmem:[#allocation15_spill] sm:$0xff]  ;;  %v3062_v42 = vld [vmem:[#allocation25_spill] sm:$0xff] }
 0x132   : > { %v909_v61 = vsub.f32 1.0, %v908_v35  ;;  %v2747_v6 = vmul.f32 %v950_v7, %v3045_v47  ;;  %v916_v23 = vand.u32 2147483647, %v3039_v50  ;;  %v918_v18 = vand.u32 2147483648, %v3039_v50 }
 0x133   : > { %v878_v28 = vmul.f32 %v3047_v9, %v3046_v54  ;;  %v1227_v48 = vmul.f32 %v3048_v41, %v3048_v41  ;;  %v930_v33 = vsel %vm2733_vm5, %v3033_v13, %v926_v53  ;;  %vm882_vm9 = vweird.f32 %v3046_v54  ;;  %v3064_v53 = vld [vmem:[#allocation17_spill] sm:$0xff]  ;;  %v3067_v41 = vld [vmem:[#allocation20_spill] sm:$0xff] }
 0x134   : > { %v910_v46 = vmul.f32 %v3040_v37, %v909_v61  ;;  %1203 = vmatpush.msrb.mxu2 %v2747_v6  ;;  %v935_v56 = vsel %vm2737_vm6, %v934_v30, %v930_v33  ;;  %vm2769_vm11 = vcmp.eq.f32.partialorder %v916_v23, 8.507059e+37  ;;  %v919_v4 = vor.u32 1.1754944e-38, %v918_v18  ;;  %v3065_v23 = vld [vmem:[#allocation7_spill] sm:$0xff] }
 0x135   : > { %vm883_vm12 = vweird.f32 %v3047_v9  ;;  %v1136_v16 = vmul.f32 %v935_v56, %v3053_v59  ;;  %v879_v10 = vsub.f32 1.0, %v878_v28  ;;  %v886_v5 = vand.u32 2147483647, %v3046_v54 }
 0x136   : > { %v911_v26 = vadd.f32 %v3040_v37, %v910_v46  ;;  %v1226_v49 = vmul.f32 %v3054_v17, %v3054_v17  ;;  %v888_v14 = vand.u32 2147483648, %v3046_v54  ;;  %v893_v12 = vmul.f32 %v3056_v25, %v3055_v52  ;;  %vm2798_vm0 = vmor %vm882_vm9, %vm883_vm12 }
 0x137   : > { %vm897_vm13 = vweird.f32 %v3055_v52  ;;  %1204 = vmatpush.msrb.mxu2 %v1136_v16  ;;  %v880_v8 = vmul.f32 %v3047_v9, %v879_v10  ;;  %vm2787_vm14 = vcmp.eq.f32.partialorder %v886_v5, 8.507059e+37  ;;  %vm898_vm15 = vweird.f32 %v3056_v25 }
 0x138   : > { %v915_v27 = vsel %vm2765_vm10, %v3040_v37, %v911_v26  ;;  %v889_v62 = vor.u32 1.1754944e-38, %v888_v14  ;;  %v894_v15 = vsub.f32 1.0, %v893_v12  ;;  %v901_v39 = vand.u32 2147483647, %v3055_v52  ;;  %vm899_vm1 = vmor %vm897_vm13, %vm898_vm15 }
 0x139   : > { %v920_v44 = vsel %vm2769_vm11, %v919_v4, %v915_v27  ;;  %v881_v20 = vadd.f32 %v3047_v9, %v880_v8  ;;  %v903_v19 = vand.u32 2147483648, %v3055_v52  ;;  %v1257_v2 = vadd.f32 %v1256_v60, %v1226_v49 }
 0x13a   : > { %v1135_v22 = vmul.f32 %v920_v44, %v3061_v57  ;;  %v895_v21 = vmul.f32 %v3056_v25, %v894_v15  ;;  %v1228_v31 = vmul.f32 %v3062_v42, %v3062_v42  ;;  %vm902_vm2 = vcmp.eq.f32.partialorder %v901_v39, 8.507059e+37 }
 0x13b   : > { %v885_v50 = vsel %vm2798_vm0, %v3047_v9, %v881_v20  ;;  %v904_v37 = vor.u32 1.1754944e-38, %v903_v19  ;;  %v1258_v35 = vadd.f32 %v1257_v2, %v1227_v48  ;;  %v1229_v38 = vmul.f32 %v3063_v3, %v3063_v3  ;;  %v3066_v9 = vld [vmem:[#allocation11_spill] sm:$0xff] }
 0x13c   : > { %1205 = vmatpush.msrb.mxu2 %v1135_v22  ;;  %v890_v34 = vsel %vm2787_vm14, %v889_v62, %v885_v50  ;;  %v896_v60 = vadd.f32 %v3056_v25, %v895_v21  ;;  %v1230_v61 = vmul.f32 %v3064_v53, %v3064_v53  ;;  %v1231_v48 = vmul.f32 %v3067_v41, %v3067_v41 }
 0x13d   : > { %v1259_v30 = vadd.f32 %v1258_v35, %v1228_v31  ;;  %v1133_v18 = vmul.f32 %v890_v34, %v3065_v23  ;;  %v1234_v4 = vmul.f32 %v1135_v22, %v1135_v22  ;;  %v1235_v26 = vmul.f32 %v1136_v16, %v1136_v16 }
 0x13e   : > { %v900_v7 = vsel %vm899_vm1, %v3056_v25, %v896_v60  ;;  %v1236_v5 = vmul.f32 %v2747_v6, %v2747_v6  ;;  %v1237_v49 = vmul.f32 %v2713_v63, %v2713_v63  ;;  %v1238_v52 = vmul.f32 %v2689_v1, %v2689_v1 }
 0x13f   : > { %v905_v47 = vsel %vm902_vm2, %v904_v37, %v900_v7  ;;  %v1260_v54 = vadd.f32 %v1259_v30, %v1229_v38  ;;  %v1232_v46 = vmul.f32 %v1133_v18, %v1133_v18  ;;  %v1152_v12 = vlaneseq }
 0x140   : > { %v1134_v28 = vmul.f32 %v905_v47, %v3066_v9  ;;  %v1239_v27 = vmul.f32 %v2664_v24, %v2664_v24  ;;  %v1240_v6 = vmul.f32 %v2642_v32, %v2642_v32  ;;  %v1155_v44 = vstv %s1501_s6 }
 0x141   : > { %v1261_v33 = vadd.f32 %v1260_v54, %v1230_v61  ;;  %v1153_v16 = vand.u32 127, %v1152_v12  ;;  %v1159_v13 = vshrl.u32 %v1152_v12, 7  ;;  %v1241_v1 = vmul.f32 %v2622_v40, %v2622_v40 }
 0x142   : > { %1206 = vmatpush.msrb.mxu2 %v1134_v28  ;;  %v1233_v55 = vmul.f32 %v1134_v28, %v1134_v28  ;;  %v1242_v24 = vmul.f32 %v2593_v58, %v2593_v58  ;;  %v1243_v32 = vmul.f32 %v2556_v0, %v2556_v0  ;;  %v1713_v2 = vmov 1.0  }
 0x143   : > { %v1262_v56 = vadd.f32 %v1261_v33, %v1231_v48  ;;  %v1154_v62 = vadd.s32 128, %v1153_v16  ;;  %v1160_v63 = vmul.u32 256, %v1159_v13  ;;  %v1156_v15 = vadd.s32 %v1155_v44, %v1153_v16 }
 0x144   : > { %1207 = vmatpush.msrb.mxu2 %v1133_v18  ;;  %v1244_v40 = vmul.f32 %v2517_v51, %v2517_v51  ;;  %v1245_v21 = vmul.f32 %v2474_v29, %v2474_v29  ;;  %v1246_v31 = vmul.f32 %v2460_v36, %v2460_v36  ;;  %v1247_v0 = vmul.f32 %v2454_v11, %v2454_v11 }
 0x145   : > { %v1263_v45 = vadd.f32 %v1262_v56, %v1232_v46  ;;  %v1157_v57 = vadd.s32 %v1155_v44, %v1154_v62  ;;  %v1163_v22 = vadd.s32 256, %v1160_v63  ;;  %vm1161_vm3 = vcmp.ge.s32.totalorder %v1156_v15, %v1160_v63 }
 0x146   : > { %v1714_v36 = vmov 0.0  }
 0x147   : > { %v1264_v59 = vadd.f32 %v1263_v45, %v1233_v55  ;;  %vm1162_vm4 = vcmp.ge.s32.totalorder %v1157_v57, %v1160_v63  ;;  %vm1165_vm5 = vcmp.lt.s32.totalorder %v1157_v57, %v1163_v22  ;;  %vm1164_vm6 = vcmp.lt.s32.totalorder %v1156_v15, %v1163_v22  ;;  %231 = vst [vmem:[%s222_s10] sm:$0x3] %v1714_v36 }
 0x148   : > { %vm1167_vm7 = vmand %vm1162_vm4, %vm1165_vm5  ;;  %232 = vst [vmem:[%s225_s13] sm:$0x1] %v1714_v36 }
 0x149   : > { %v1265_v10 = vadd.f32 %v1264_v59, %v1234_v4  ;;  %1505 = vmatmul.msk.f32.vlgmr.msrb.gmra.mxu2 %vm1167_vm7, %v1713_v2  ;;  %vm1166_vm8 = vmand %vm1161_vm3, %vm1164_vm6 }
 0x14a   : > { %1504 = vmatmul.msk.f32.vlgmr.msrb.gmra.mxu1 %vm1166_vm8, %v1713_v2 }
 0x14b   : > { %v1266_v17 = vadd.f32 %v1265_v10, %v1235_v26 }
 0x14d   : > { %v1267_v14 = vadd.f32 %v1266_v17, %v1236_v5 }
 0x14e   : > { %v1212_v61 = vld [vmem:[%s222_s10] sm:$0x3] }
 0x14f   : > { %v1268_v25 = vadd.f32 %v1267_v14, %v1237_v49  ;;  %v1215_v38 = vld [vmem:[%s225_s13] sm:$0x1] }
 0x151   : > { %v1269_v8 = vadd.f32 %v1268_v25, %v1238_v52 }
 0x153   : > { %v1270_v43 = vadd.f32 %v1269_v8, %v1239_v27 }
 0x155   : > { %v1271_v39 = vadd.f32 %v1270_v43, %v1240_v6 }
 0x157   : > { %v1272_v20 = vadd.f32 %v1271_v39, %v1241_v1 }
 0x159   : > { %v1273_v19 = vadd.f32 %v1272_v20, %v1242_v24 }
 0x15b   : > { %v1274_v58 = vadd.f32 %v1273_v19, %v1243_v32 }
 0x15d   : > { %v1275_v42 = vadd.f32 %v1274_v58, %v1244_v40 }
 0x15f   : > { %v1276_v50 = vadd.f32 %v1275_v42, %v1245_v21 }
 0x161   : > { %v1277_v37 = vadd.f32 %v1276_v50, %v1246_v31 }
 0x163   : > { %v1278_v35 = vadd.f32 %v1277_v37, %v1247_v0 }
 0x165   : > { %v1279_v34 = vrot.slane %v1278_v35, 4 }
 0x167   : > { %v1280_v60 = vadd.f32 %v1279_v34, %v1278_v35 }
 0x169   : > { %v1281_v3 = vrot.slane %v1280_v60, 2 }
 0x16b   : > { %v1282_v51 = vadd.f32 %v1281_v3, %v1280_v60 }
 0x16d   : > { %v1283_v11 = vrot.slane %v1282_v51, 1 }
 0x16f   : > { %v1284_v29 = vadd.f32 %v1283_v11, %v1282_v51 }
 0x171   : > { %v1285_v30 = vadd.f32 %v1284_v29, %v1215_v38 }
 0x173   : > { %1286 = vst [vmem:[%s225_s13] sm:$0x1] %v1285_v30 }
 0x1c7   : > { %v1189_v7 = vpop.f32.mrf.mxu1 }
 0x1cc   : > { %v1209_v53 = vpop.f32.mrf.mxu2 }
 0x1cd   : > { %v1210_v47 = vadd.f32 %v1209_v53, %v1189_v7 }
 0x1cf   : > { %v1213_v23 = vadd.f32 %v1212_v61, %v1210_v47 }
 0x1d1   : > { %1214 = vst [vmem:[%s222_s10] sm:$0x3] %v1213_v23 }
 0x1d2 PF: > { %s15_s17 = sadd.s32 1, %s1710_s17   ;;  %s3068_s15 = smov %s1706_s16 }
 0x1d3   : > { %p12_p6 = scmp.ge.s32.totalorder %s15_s17, 4   ;;  %s3069_s16 = smov %s3071_s18 }
 0x1d5   :  { %14 = sbr.rel (!%p12_p6) target bundleno = 2 (0x2), region = 78 }

</bundles_post_ra>
